<compile_context>
chip_gen: v5e
topology: v5e:2x2
jax: 0.10.0
libtpu: 0.0.40
codegen_flags: <defaults>
</compile_context>

<pallas_src>
import jax
import jax.numpy as jnp
from jax import lax
from jax.experimental import pallas as pl
from jax.experimental.pallas import tpu as pltpu

LANE = 128                        # channel dims padded to multiples of this
TM_MAX = 512                      # max rows (N*Ho*Wo) per grid step
VMEM_BUDGET = 30 * 1024 * 1024    # double-buffered working-set budget (fits v7x 64 MiB)


# -----------------------------------------------------------------------------
# Pallas kernels (hot path: bf16 matmul -> f32 BN -> add -> ReLU, all fused)
# -----------------------------------------------------------------------------
def _conv_bn_relu_kernel(p_ref, w_ref, scale_ref, bias_ref, o_ref):
    acc = jnp.dot(p_ref[...], w_ref[...], preferred_element_type=jnp.float32)
    y = jnp.maximum(acc * scale_ref[...] + bias_ref[...], 0.0)
    o_ref[...] = y.astype(o_ref.dtype)


def _conv_bn_add_relu_kernel(p_ref, w_ref, scale_ref, bias_ref, sc_ref, o_ref):
    acc = jnp.dot(p_ref[...], w_ref[...], preferred_element_type=jnp.float32)
    y = acc * scale_ref[...] + bias_ref[...] + sc_ref[...]
    o_ref[...] = jnp.maximum(y, 0.0).astype(o_ref.dtype)


def _conv_bn_proj_add_relu_kernel(p_ref, w_ref, scale_ref, bias_ref,
                                  scin_ref, wsc_ref, o_ref):
    acc = jnp.dot(p_ref[...], w_ref[...], preferred_element_type=jnp.float32)
    sc = jnp.dot(scin_ref[...], wsc_ref[...], preferred_element_type=jnp.float32)
    y = acc * scale_ref[...] + bias_ref[...] + sc
    o_ref[...] = jnp.maximum(y, 0.0).astype(o_ref.dtype)


# -----------------------------------------------------------------------------
# Tiling / VMEM planning
# -----------------------------------------------------------------------------
def _round_up(x, m):
    return (x + m - 1) // m * m


def _plan_rows(m_rows, row_bytes_dbuf, fixed_bytes_dbuf):
    """Pick a row-tile size, grid length and explicit VMEM limit for one call."""
    tm = m_rows if m_rows <= TM_MAX else TM_MAX
    while tm > 8 and fixed_bytes_dbuf + tm * row_bytes_dbuf > VMEM_BUDGET:
        tm = max(8, _round_up(tm // 2, 8))
    grid = -(-m_rows // tm)
    need = fixed_bytes_dbuf + tm * row_bytes_dbuf
    vmem_limit = int(min(max(1.5 * need + (2 << 20), 32 << 20), 48 << 20))
    return tm, grid, vmem_limit


# -----------------------------------------------------------------------------
# pallas_call wrappers
# -----------------------------------------------------------------------------
def _call_conv_bn_relu(patches, w, scale, bias, out_dtype=jnp.float32):
    M, K = patches.shape
    C = w.shape[1]
    ob = 2 if out_dtype == jnp.bfloat16 else 4
    tm, grid, vmem = _plan_rows(M, 2 * (K * 2 + C * ob),
                                2 * (K * C * 2 + 2 * C * 4))
    return pl.pallas_call(
        _conv_bn_relu_kernel,
        out_shape=jax.ShapeDtypeStruct((M, C), out_dtype),
        grid=(grid,),
        in_specs=[
            pl.BlockSpec((tm, K), lambda i: (i, 0)),
            pl.BlockSpec((K, C), lambda i: (0, 0)),
            pl.BlockSpec((1, C), lambda i: (0, 0)),
            pl.BlockSpec((1, C), lambda i: (0, 0)),
        ],
        out_specs=pl.BlockSpec((tm, C), lambda i: (i, 0)),
        compiler_params=pltpu.CompilerParams(
            dimension_semantics=("parallel",), vmem_limit_bytes=vmem),
    )(patches, w, scale, bias)


def _call_conv_bn_add_relu(patches, w, scale, bias, sc):
    M, K = patches.shape
    C = w.shape[1]
    tm, grid, vmem = _plan_rows(M, 2 * (K * 2 + C * 4 + C * 4),
                                2 * (K * C * 2 + 2 * C * 4))
    return pl.pallas_call(
        _conv_bn_add_relu_kernel,
        out_shape=jax.ShapeDtypeStruct((M, C), jnp.float32),
        grid=(grid,),
        in_specs=[
            pl.BlockSpec((tm, K), lambda i: (i, 0)),
            pl.BlockSpec((K, C), lambda i: (0, 0)),
            pl.BlockSpec((1, C), lambda i: (0, 0)),
            pl.BlockSpec((1, C), lambda i: (0, 0)),
            pl.BlockSpec((tm, C), lambda i: (i, 0)),
        ],
        out_specs=pl.BlockSpec((tm, C), lambda i: (i, 0)),
        compiler_params=pltpu.CompilerParams(
            dimension_semantics=("parallel",), vmem_limit_bytes=vmem),
    )(patches, w, scale, bias, sc)


def _call_conv_bn_proj_add_relu(patches, w, scale, bias, scin, wsc):
    M, K = patches.shape
    C = w.shape[1]
    Cin = wsc.shape[0]
    tm, grid, vmem = _plan_rows(M, 2 * (K * 2 + Cin * 2 + C * 4),
                                2 * (K * C * 2 + Cin * C * 2 + 2 * C * 4))
    return pl.pallas_call(
        _conv_bn_proj_add_relu_kernel,
        out_shape=jax.ShapeDtypeStruct((M, C), jnp.float32),
        grid=(grid,),
        in_specs=[
            pl.BlockSpec((tm, K), lambda i: (i, 0)),
            pl.BlockSpec((K, C), lambda i: (0, 0)),
            pl.BlockSpec((1, C), lambda i: (0, 0)),
            pl.BlockSpec((1, C), lambda i: (0, 0)),
            pl.BlockSpec((tm, Cin), lambda i: (i, 0)),
            pl.BlockSpec((Cin, C), lambda i: (0, 0)),
        ],
        out_specs=pl.BlockSpec((tm, C), lambda i: (i, 0)),
        compiler_params=pltpu.CompilerParams(
            dimension_semantics=("parallel",), vmem_limit_bytes=vmem),
    )(patches, w, scale, bias, scin, wsc)


# -----------------------------------------------------------------------------
# Glue: im2col, BN folding, weight layout, BasicBlock forward
# -----------------------------------------------------------------------------
def _extract_patches(x_nhwc, ksize, stride, pad):
    """im2col: (N,H,W,C) -> (N,Ho,Wo,ksize*ksize*C); channel fastest within a tap."""
    x = jnp.pad(x_nhwc, ((0, 0), (pad, pad), (pad, pad), (0, 0)))
    N, H, W, C = x.shape
    Ho = (H - ksize) // stride + 1
    Wo = (W - ksize) // stride + 1
    taps = []
    for dy in range(ksize):
        for dx in range(ksize):
            taps.append(x[:, dy:dy + stride * Ho:stride, dx:dx + stride * Wo:stride, :])
    return jnp.concatenate(taps, axis=-1)


def _fold_bn(gamma, beta, mean, var, c_pad, eps=1e-5):
    scale = gamma / jnp.sqrt(var + eps)
    bias = beta - mean * scale
    pad = (0, c_pad - gamma.shape[0])
    return (jnp.pad(scale, pad)[None, :].astype(jnp.float32),
            jnp.pad(bias, pad)[None, :].astype(jnp.float32))


def _w_matrix(w_oihw, cin_p, cout_p):
    # (C_out, C_in, KH, KW) -> (KH*KW*cin_p, cout_p) bf16, matching im2col tap order,
    # with zero padding of both channel dims for lane-dense MXU tiles.
    co, ci, kh, kw = w_oihw.shape
    w = jnp.transpose(w_oihw, (2, 3, 1, 0))                      # (kh, kw, ci, co)
    w = jnp.pad(w, ((0, 0), (0, 0), (0, cin_p - ci), (0, cout_p - co)))
    return w.reshape(kh * kw * cin_p, cout_p).astype(jnp.bfloat16)


def basic_block_forward(x_nchw, params, stride):
    x = jnp.transpose(x_nchw, (0, 2, 3, 1)).astype(jnp.float32)   # NHWC f32
    N, H, W, Cin = x.shape
    Cout = params["w1"].shape[0]
    Cin_p = _round_up(Cin, LANE)
    Cout_p = _round_up(Cout, LANE)
    use_projection = (stride != 1) or (Cin != Cout)

    # Channel-padded bf16 activations: matmul operands / im2col source
    # (bf16 halves the 9x-amplified patch traffic).
    x_bf = jnp.pad(x, ((0, 0), (0, 0), (0, 0), (0, Cin_p - Cin))
                   ).astype(jnp.bfloat16)

    s1, b1 = _fold_bn(params["bn1_gamma"], params["bn1_beta"],
                      params["bn1_mean"], params["bn1_var"], Cout_p)
    s2, b2 = _fold_bn(params["bn2_gamma"], params["bn2_beta"],
                      params["bn2_mean"], params["bn2_var"], Cout_p)

    w1m = _w_matrix(params["w1"], Cin_p, Cout_p)      # (9*Cin_p, Cout_p) bf16
    w2m = _w_matrix(params["w2"], Cout_p, Cout_p)     # (9*Cout_p, Cout_p) bf16

    # conv1 (3x3, stride) + BN1 + ReLU  -> bf16 intermediate, channels kept padded
    p1 = _extract_patches(x_bf, 3, stride, 1)
    Ho, Wo = p1.shape[1], p1.shape[2]
    M = N * Ho * Wo
    out1 = _call_conv_bn_relu(p1.reshape(M, 9 * Cin_p), w1m, s1, b1,
                              out_dtype=jnp.bfloat16)
    out1_img = out1.reshape(N, Ho, Wo, Cout_p)

    # conv2 (3x3, stride 1) + BN2 + shortcut + ReLU, all in one kernel
    p2 = _extract_patches(out1_img, 3, 1, 1).reshape(M, 9 * Cout_p)

    if use_projection:
        # Projection shortcut: bare 1x1 conv (no BN), matmul fused into the kernel.
        scin = x_bf[:, ::stride, ::stride, :][:, :Ho, :Wo, :].reshape(M, Cin_p)
        wscm = _w_matrix(params["wsc"], Cin_p, Cout_p)            # (Cin_p, Cout_p)
        out = _call_conv_bn_proj_add_relu(p2, w2m, s2, b2, scin, wscm)
    else:
        # Identity shortcut (Cin_p == Cout_p here); keep it f32 for exactness.
        sc = jnp.pad(x, ((0, 0), (0, 0), (0, 0), (0, Cout_p - Cin))
                     ).reshape(M, Cout_p)
        out = _call_conv_bn_add_relu(p2, w2m, s2, b2, sc)

    out = out.reshape(N, Ho, Wo, Cout_p)[..., :Cout]              # drop channel pad once
    return jnp.transpose(out, (0, 3, 1, 2))                       # back to NCHW


# -----------------------------------------------------------------------------
# Reference implementation (plain JAX; convs use the same bf16 operand rounding)
# -----------------------------------------------------------------------------
def reference_forward(x_nchw, params, stride):
    x = jnp.transpose(x_nchw, (0, 2, 3, 1)).astype(jnp.float32)

    def conv(inp, w, s, pad):
        wh = jnp.transpose(w, (2, 3, 1, 0)).astype(jnp.bfloat16)
        return lax.conv_general_dilated(
            inp.astype(jnp.bfloat16), wh, (s, s), ((pad, pad), (pad, pad)),
            dimension_numbers=("NHWC", "HWIO", "NHWC"),
            preferred_element_type=jnp.float32)

    def bn(y, g, b, m, v, eps=1e-5):
        return (y - m) / jnp.sqrt(v + eps) * g + b

    out = conv(x, params["w1"], stride, 1)
    out = jnp.maximum(bn(out, params["bn1_gamma"], params["bn1_beta"],
                         params["bn1_mean"], params["bn1_var"]), 0.0)
    out = conv(out, params["w2"], 1, 1)
    out = bn(out, params["bn2_gamma"], params["bn2_beta"],
             params["bn2_mean"], params["bn2_var"])
    if stride != 1 or x.shape[-1] != params["w1"].shape[0]:
        sc = conv(x, params["wsc"], stride, 0)
    else:
        sc = x
    out = jnp.maximum(out + sc, 0.0)
    return jnp.transpose(out, (0, 3, 1, 2))


def init_params(key, in_dims, out_dims):
    ks = jax.random.split(key, 11)
    return {
        "w1": jax.random.normal(ks[0], (out_dims, in_dims, 3, 3), jnp.float32) * 0.1,
        "w2": jax.random.normal(ks[1], (out_dims, out_dims, 3, 3), jnp.float32) * 0.1,
        "wsc": jax.random.normal(ks[2], (out_dims, in_dims, 1, 1), jnp.float32) * 0.1,
        "bn1_gamma": jax.random.uniform(ks[3], (out_dims,), jnp.float32, 0.5, 1.5),
        "bn1_beta": jax.random.normal(ks[4], (out_dims,), jnp.float32) * 0.1,
        "bn1_mean": jax.random.normal(ks[5], (out_dims,), jnp.float32) * 0.1,
        "bn1_var": jax.random.uniform(ks[6], (out_dims,), jnp.float32, 0.5, 1.5),
        "bn2_gamma": jax.random.uniform(ks[7], (out_dims,), jnp.float32, 0.5, 1.5),
        "bn2_beta": jax.random.normal(ks[8], (out_dims,), jnp.float32) * 0.1,
        "bn2_mean": jax.random.normal(ks[9], (out_dims,), jnp.float32) * 0.1,
        "bn2_var": jax.random.uniform(ks[10], (out_dims,), jnp.float32, 0.5, 1.5),
    }


if __name__ == "__main__":
    key = jax.random.PRNGKey(0)
    kx1, kp1, kx2, kp2 = jax.random.split(key, 4)

    fwd = jax.jit(basic_block_forward, static_argnums=2)
    ref = jax.jit(reference_forward, static_argnums=2)

    # Test 1: projection-shortcut block (stride 2, channel change) -> kernels 1 & 3
    in_dims, out_dims, stride = 4, 8, 2
    x = jax.random.normal(kx1, (2, in_dims, 16, 16), jnp.float32)   # NCHW, PyTorch-style
    params = init_params(kp1, in_dims, out_dims)
    y = jax.block_until_ready(fwd(x, params, stride))
    y_ref = jax.block_until_ready(ref(x, params, stride))
    assert y.shape == (2, out_dims, 8, 8), y.shape
    err = float(jnp.max(jnp.abs(y - y_ref)))
    assert err < 5e-3, err

    # Test 2: identity-shortcut block (stride 1, same channels) -> kernels 1 & 2
    in2, out2, stride2 = 8, 8, 1
    x2 = jax.random.normal(kx2, (2, in2, 8, 8), jnp.float32)
    params2 = init_params(kp2, in2, out2)
    y2 = jax.block_until_ready(fwd(x2, params2, stride2))
    y2_ref = jax.block_until_ready(ref(x2, params2, stride2))
    assert y2.shape == (2, out2, 8, 8), y2.shape
    err2 = float(jnp.max(jnp.abs(y2 - y2_ref)))
    assert err2 < 5e-3, err2

    print("KERNEL_OK")
</pallas_src>

<mosaic_0001>
module attributes {stable_mosaic.version = 11 : i64} {
  func.func @_conv_bn_relu_kernel(%arg0: i32, %arg1: memref<128x1152xbf16, #tpu.memory_space<vmem>>, %arg2: memref<1152x128xbf16, #tpu.memory_space<vmem>>, %arg3: memref<1x128xf32, #tpu.memory_space<vmem>>, %arg4: memref<1x128xf32, #tpu.memory_space<vmem>>, %arg5: memref<128x128xbf16, #tpu.memory_space<vmem>>) attributes {dimension_semantics = [#tpu.dimension_semantics<parallel>], iteration_bounds = array<i64: 1>, scalar_prefetch = 0 : i64, scratch_operands = 0 : i64, tpu.core_type = #tpu.core_type<tc>, window_params = [{transform_indices = @transform_0, window_bounds = array<i64: 128, 1152>}, {pipeline_mode = #tpu.pipeline_mode<synchronous>, transform_indices = @transform_1, window_bounds = array<i64: 1152, 128>}, {pipeline_mode = #tpu.pipeline_mode<synchronous>, transform_indices = @transform_2, window_bounds = array<i64: 1, 128>}, {pipeline_mode = #tpu.pipeline_mode<synchronous>, transform_indices = @transform_3, window_bounds = array<i64: 1, 128>}, {transform_indices = @transform_4, window_bounds = array<i64: 128, 128>}]} {
    %c0 = arith.constant 0 : index
    %c0_0 = arith.constant 0 : index
    %0 = vector.load %arg1[%c0, %c0_0] : memref<128x1152xbf16, #tpu.memory_space<vmem>>, vector<128x1152xbf16>
    %c0_1 = arith.constant 0 : index
    %c0_2 = arith.constant 0 : index
    %1 = vector.load %arg2[%c0_1, %c0_2] : memref<1152x128xbf16, #tpu.memory_space<vmem>>, vector<1152x128xbf16>
    %cst = arith.constant dense<0.000000e+00> : vector<128x128xf32>
    %2 = tpu.matmul %0, %1, %cst {dimension_numbers = #tpu.dot_dimension_numbers<[1], [0], [0], [1], [0, 0, 1, 1], [], []>} : vector<128x1152xbf16>, vector<1152x128xbf16>, vector<128x128xf32> -> vector<128x128xf32>
    %c0_3 = arith.constant 0 : index
    %c0_4 = arith.constant 0 : index
    %3 = vector.load %arg3[%c0_3, %c0_4] : memref<1x128xf32, #tpu.memory_space<vmem>>, vector<1x128xf32>
    %4 = vector.broadcast %3 : vector<1x128xf32> to vector<128x128xf32>
    %5 = arith.mulf %2, %4 : vector<128x128xf32>
    %c0_5 = arith.constant 0 : index
    %c0_6 = arith.constant 0 : index
    %6 = vector.load %arg4[%c0_5, %c0_6] : memref<1x128xf32, #tpu.memory_space<vmem>>, vector<1x128xf32>
    %7 = vector.broadcast %6 : vector<1x128xf32> to vector<128x128xf32>
    %8 = arith.addf %5, %7 : vector<128x128xf32>
    %cst_7 = arith.constant 0.000000e+00 : f32
    %9 = vector.broadcast %cst_7 : f32 to vector<128x128xf32>
    %10 = arith.maximumf %8, %9 : vector<128x128xf32>
    %11 = arith.truncf %10 : vector<128x128xf32> to vector<128x128xbf16>
    %c0_8 = arith.constant 0 : index
    %c0_9 = arith.constant 0 : index
    %12 = vector.load %arg5[%c0_8, %c0_9] : memref<128x128xbf16, #tpu.memory_space<vmem>>, vector<128x128xbf16>
    tpu.vector_store %arg5[%c0_8, %c0_9], %11 {strides = array<i32>} : memref<128x128xbf16, #tpu.memory_space<vmem>>, vector<128x128xbf16>,
    return
  }
  func.func @transform_0(%arg0: i32) -> (i32, i32) {
    %c0_i32 = arith.constant 0 : i32
    %c0_i32_0 = arith.constant 0 : i32
    return %arg0, %c0_i32 : i32, i32
  }
  func.func @transform_1(%arg0: i32) -> (i32, i32) {
    %c0_i32 = arith.constant 0 : i32
    %c0_i32_0 = arith.constant 0 : i32
    %c0_i32_1 = arith.constant 0 : i32
    return %c0_i32, %c0_i32_0 : i32, i32
  }
  func.func @transform_2(%arg0: i32) -> (i32, i32) {
    %c0_i32 = arith.constant 0 : i32
    %c0_i32_0 = arith.constant 0 : i32
    %c0_i32_1 = arith.constant 0 : i32
    return %c0_i32, %c0_i32_0 : i32, i32
  }
  func.func @transform_3(%arg0: i32) -> (i32, i32) {
    %c0_i32 = arith.constant 0 : i32
    %c0_i32_0 = arith.constant 0 : i32
    %c0_i32_1 = arith.constant 0 : i32
    return %c0_i32, %c0_i32_0 : i32, i32
  }
  func.func @transform_4(%arg0: i32) -> (i32, i32) {
    %c0_i32 = arith.constant 0 : i32
    %c0_i32_0 = arith.constant 0 : i32
    return %arg0, %c0_i32 : i32, i32
  }
}

module attributes {stable_mosaic.version = 11 : i64} {
  func.func @_conv_bn_proj_add_relu_kernel(%arg0: i32, %arg1: memref<128x1152xbf16, #tpu.memory_space<vmem>>, %arg2: memref<1152x128xbf16, #tpu.memory_space<vmem>>, %arg3: memref<1x128xf32, #tpu.memory_space<vmem>>, %arg4: memref<1x128xf32, #tpu.memory_space<vmem>>, %arg5: memref<128x128xbf16, #tpu.memory_space<vmem>>, %arg6: memref<128x128xbf16, #tpu.memory_space<vmem>>, %arg7: memref<128x128xf32, #tpu.memory_space<vmem>>) attributes {dimension_semantics = [#tpu.dimension_semantics<parallel>], iteration_bounds = array<i64: 1>, scalar_prefetch = 0 : i64, scratch_operands = 0 : i64, tpu.core_type = #tpu.core_type<tc>, window_params = [{transform_indices = @transform_0, window_bounds = array<i64: 128, 1152>}, {pipeline_mode = #tpu.pipeline_mode<synchronous>, transform_indices = @transform_1, window_bounds = array<i64: 1152, 128>}, {pipeline_mode = #tpu.pipeline_mode<synchronous>, transform_indices = @transform_2, window_bounds = array<i64: 1, 128>}, {pipeline_mode = #tpu.pipeline_mode<synchronous>, transform_indices = @transform_3, window_bounds = array<i64: 1, 128>}, {transform_indices = @transform_4, window_bounds = array<i64: 128, 128>}, {pipeline_mode = #tpu.pipeline_mode<synchronous>, transform_indices = @transform_5, window_bounds = array<i64: 128, 128>}, {transform_indices = @transform_6, window_bounds = array<i64: 128, 128>}]} {
    %c0 = arith.constant 0 : index
    %c0_0 = arith.constant 0 : index
    %0 = vector.load %arg1[%c0, %c0_0] : memref<128x1152xbf16, #tpu.memory_space<vmem>>, vector<128x1152xbf16>
    %c0_1 = arith.constant 0 : index
    %c0_2 = arith.constant 0 : index
    %1 = vector.load %arg2[%c0_1, %c0_2] : memref<1152x128xbf16, #tpu.memory_space<vmem>>, vector<1152x128xbf16>
    %cst = arith.constant dense<0.000000e+00> : vector<128x128xf32>
    %2 = tpu.matmul %0, %1, %cst {dimension_numbers = #tpu.dot_dimension_numbers<[1], [0], [0], [1], [0, 0, 1, 1], [], []>} : vector<128x1152xbf16>, vector<1152x128xbf16>, vector<128x128xf32> -> vector<128x128xf32>
    %c0_3 = arith.constant 0 : index
    %c0_4 = arith.constant 0 : index
    %3 = vector.load %arg5[%c0_3, %c0_4] : memref<128x128xbf16, #tpu.memory_space<vmem>>, vector<128x128xbf16>
    %c0_5 = arith.constant 0 : index
    %c0_6 = arith.constant 0 : index
    %4 = vector.load %arg6[%c0_5, %c0_6] : memref<128x128xbf16, #tpu.memory_space<vmem>>, vector<128x128xbf16>
    %cst_7 = arith.constant dense<0.000000e+00> : vector<128x128xf32>
    %5 = tpu.matmul %3, %4, %cst_7 {dimension_numbers = #tpu.dot_dimension_numbers<[1], [0], [0], [1], [0, 0, 1, 1], [], []>} : vector<128x128xbf16>, vector<128x128xbf16>, vector<128x128xf32> -> vector<128x128xf32>
    %c0_8 = arith.constant 0 : index
    %c0_9 = arith.constant 0 : index
    %6 = vector.load %arg3[%c0_8, %c0_9] : memref<1x128xf32, #tpu.memory_space<vmem>>, vector<1x128xf32>
    %7 = vector.broadcast %6 : vector<1x128xf32> to vector<128x128xf32>
    %8 = arith.mulf %2, %7 : vector<128x128xf32>
    %c0_10 = arith.constant 0 : index
    %c0_11 = arith.constant 0 : index
    %9 = vector.load %arg4[%c0_10, %c0_11] : memref<1x128xf32, #tpu.memory_space<vmem>>, vector<1x128xf32>
    %10 = vector.broadcast %9 : vector<1x128xf32> to vector<128x128xf32>
    %11 = arith.addf %8, %10 : vector<128x128xf32>
    %12 = arith.addf %11, %5 : vector<128x128xf32>
    %cst_12 = arith.constant 0.000000e+00 : f32
    %13 = vector.broadcast %cst_12 : f32 to vector<128x128xf32>
    %14 = arith.maximumf %12, %13 : vector<128x128xf32>
    %c0_13 = arith.constant 0 : index
    %c0_14 = arith.constant 0 : index
    %15 = vector.load %arg7[%c0_13, %c0_14] : memref<128x128xf32, #tpu.memory_space<vmem>>, vector<128x128xf32>
    tpu.vector_store %arg7[%c0_13, %c0_14], %14 {strides = array<i32>} : memref<128x128xf32, #tpu.memory_space<vmem>>, vector<128x128xf32>,
    return
  }
  func.func @transform_0(%arg0: i32) -> (i32, i32) {
    %c0_i32 = arith.constant 0 : i32
    %c0_i32_0 = arith.constant 0 : i32
    return %arg0, %c0_i32 : i32, i32
  }
  func.func @transform_1(%arg0: i32) -> (i32, i32) {
    %c0_i32 = arith.constant 0 : i32
    %c0_i32_0 = arith.constant 0 : i32
    %c0_i32_1 = arith.constant 0 : i32
    return %c0_i32, %c0_i32_0 : i32, i32
  }
  func.func @transform_2(%arg0: i32) -> (i32, i32) {
    %c0_i32 = arith.constant 0 : i32
    %c0_i32_0 = arith.constant 0 : i32
    %c0_i32_1 = arith.constant 0 : i32
    return %c0_i32, %c0_i32_0 : i32, i32
  }
  func.func @transform_3(%arg0: i32) -> (i32, i32) {
    %c0_i32 = arith.constant 0 : i32
    %c0_i32_0 = arith.constant 0 : i32
    %c0_i32_1 = arith.constant 0 : i32
    return %c0_i32, %c0_i32_0 : i32, i32
  }
  func.func @transform_4(%arg0: i32) -> (i32, i32) {
    %c0_i32 = arith.constant 0 : i32
    %c0_i32_0 = arith.constant 0 : i32
    return %arg0, %c0_i32 : i32, i32
  }
  func.func @transform_5(%arg0: i32) -> (i32, i32) {
    %c0_i32 = arith.constant 0 : i32
    %c0_i32_0 = arith.constant 0 : i32
    %c0_i32_1 = arith.constant 0 : i32
    return %c0_i32, %c0_i32_0 : i32, i32
  }
  func.func @transform_6(%arg0: i32) -> (i32, i32) {
    %c0_i32 = arith.constant 0 : i32
    %c0_i32_0 = arith.constant 0 : i32
    return %arg0, %c0_i32 : i32, i32
  }
}

</mosaic_0001>

<bundles_post_ra>
// kernel: basic_block_forward.3
= control target key start
LH: loop header
LB: loop body
LE: loop exit
PB: predicated region body
PF: predicated region fallthrough
CT: control target
= control target key end

     0   :  { %s3492_s1 = inlined_call_operand.vmem [shape: bf16[1152,128], index: 1, kind: input, shape index: {}]   ;;  %s3493_s0 = inlined_call_operand.vmem [shape: bf16[128,1152], index: 0, kind: input, shape index: {}]   ;;  %s3494_s5 = inlined_call_operand.vmem [shape: bf16[128,128], index: 5, kind: input, shape index: {}]   ;;  %s3495_s4 = inlined_call_operand.vmem [shape: bf16[128,128], index: 4, kind: input, shape index: {}]   ;;  %s3496_s2 = inlined_call_operand.vmem [shape: f32[1,128], index: 2, kind: input, shape index: {}]   ;;  %s3497_s3 = inlined_call_operand.vmem [shape: f32[1,128], index: 3, kind: input, shape index: {}]   ;;  %s3498_s6 = inlined_call_operand.vmem [shape: f32[128,128], index: 6, kind: output, shape index: {}]  }
   0x1   :  { %v2476_v0 = vld [vmem:[%s3492_s1 + $0x38] sm:$0xff]  ;;  %v2475_v2 = vld [vmem:[%s3492_s1 + $0x30] sm:$0xff]  ;;  %v2474_v4 = vld [vmem:[%s3492_s1 + $0x28] sm:$0xff] }
   0x2   :  { %v2484_v1 = vld [vmem:[%s3492_s1 + $0x78] sm:$0xff]  ;;  %2557 = vmatpush.bf16.msra.mxu2 %v2476_v0  ;;  %v2483_v3 = vld [vmem:[%s3492_s1 + $0x70] sm:$0xff]  ;;  %1047 = vmatpush.bf16.msra.mxu0 %v2476_v0  ;;  %v2482_v5 = vld [vmem:[%s3492_s1 + $0x68] sm:$0xff] }
   0x3   :  { %2565 = vmatpush.bf16.msra.mxu3 %v2484_v1  ;;  %1096 = vmatpush.bf16.msra.mxu1 %v2484_v1  ;;  %v2473_v6 = vld [vmem:[%s3492_s1 + $0x20] sm:$0xff]  ;;  %v2472_v8 = vld [vmem:[%s3492_s1 + $0x18] sm:$0xff]  ;;  %v2471_v10 = vld [vmem:[%s3492_s1 + $0x10] sm:$0xff] }
   0x4   :  { %v2481_v7 = vld [vmem:[%s3492_s1 + $0x60] sm:$0xff]  ;;  %v2480_v9 = vld [vmem:[%s3492_s1 + $0x58] sm:$0xff]  ;;  %v2479_v11 = vld [vmem:[%s3492_s1 + $0x50] sm:$0xff] }
   0x5   :  { %v2470_v12 = vld [vmem:[%s3492_s1 + $0x8] sm:$0xff]  ;;  %v2469_v14 = vld [vmem:[%s3492_s1] sm:$0xff]  ;;  %v2492_v24 = vld [vmem:[%s3492_s1 + $0xb8] sm:$0xff] }
   0x6   :  { %2558 = vmatpush.bf16.msra.mxu2 %v2475_v2  ;;  %1048 = vmatpush.bf16.msra.mxu0 %v2475_v2  ;;  %v2478_v13 = vld [vmem:[%s3492_s1 + $0x48] sm:$0xff]  ;;  %v2477_v15 = vld [vmem:[%s3492_s1 + $0x40] sm:$0xff]  ;;  %v2500_v25 = vld [vmem:[%s3492_s1 + $0xf8] sm:$0xff] }
   0x7   :  { %2566 = vmatpush.bf16.msra.mxu3 %v2483_v3  ;;  %1097 = vmatpush.bf16.msra.mxu1 %v2483_v3  ;;  %v1903_v16 = vld [vmem:[%s3493_s0 + $0x120] sm:$0xf]  ;;  %v2437_v17 = vld [vmem:[%s3493_s0 + $0x140] sm:$0xf0]  ;;  %v1905_v19 = vld [vmem:[%s3493_s0 + $0x144] sm:$0xf0] }
   0x8   :  { %v2433_v18 = vld [vmem:[%s3493_s0 + $0x124] sm:$0xf]  ;;  %v1759_v20 = vld [vmem:[%s3493_s0] sm:$0xf]  ;;  %v1761_v23 = vld [vmem:[%s3493_s0 + $0x24] sm:$0xf0]  ;;  %v1904_v26 = vor.u32 %v2437_v17, %v1903_v16 }
   0x9   :  { %v2401_v21 = vld [vmem:[%s3493_s0 + $0x20] sm:$0xf0]  ;;  %v1908_v27 = vor.u32 %v2433_v18, %v1905_v19  ;;  %v2508_v30 = vld [vmem:[%s3492_s1 + $0x138] sm:$0xff]  ;;  %v2491_v32 = vld [vmem:[%s3492_s1 + $0xb0] sm:$0xff] }
   0xa   :  { %2559 = vmatpush.bf16.msra.mxu2 %v2474_v4  ;;  %1049 = vmatpush.bf16.msra.mxu0 %v2474_v4  ;;  %v2397_v22 = vld [vmem:[%s3493_s0 + $0x4] sm:$0xf]  ;;  %v1760_v28 = vor.u32 %v2401_v21, %v1759_v20  ;;  %v2516_v31 = vld [vmem:[%s3492_s1 + $0x178] sm:$0xff]  ;;  %v2499_v33 = vld [vmem:[%s3492_s1 + $0xf0] sm:$0xff] }
   0xb   :  { %2567 = vmatpush.bf16.msra.mxu3 %v2482_v5  ;;  %1098 = vmatpush.bf16.msra.mxu1 %v2482_v5  ;;  %v1764_v29 = vor.u32 %v2397_v22, %v1761_v23  ;;  %v2507_v34 = vld [vmem:[%s3492_s1 + $0x130] sm:$0xff]  ;;  %v2490_v36 = vld [vmem:[%s3492_s1 + $0xa8] sm:$0xff]  ;;  %v2489_v41 = vld [vmem:[%s3492_s1 + $0xa0] sm:$0xff] }
   0xc   :  { %v2515_v35 = vld [vmem:[%s3492_s1 + $0x170] sm:$0xff]  ;;  %v2498_v37 = vld [vmem:[%s3492_s1 + $0xe8] sm:$0xff]  ;;  %v2497_v42 = vld [vmem:[%s3492_s1 + $0xe0] sm:$0xff] }
   0xd   :  { %v2506_v38 = vld [vmem:[%s3492_s1 + $0x128] sm:$0xff]  ;;  %v1941_v45 = vld [vmem:[%s3493_s0 + $0x18c] sm:$0xf0]  ;;  %v2505_v50 = vld [vmem:[%s3492_s1 + $0x120] sm:$0xff] }
   0xe   :  { %2560 = vmatpush.bf16.msra.mxu2 %v2473_v6  ;;  %1050 = vmatpush.bf16.msra.mxu0 %v2473_v6  ;;  %v2514_v39 = vld [vmem:[%s3492_s1 + $0x168] sm:$0xff]  ;;  %v1797_v49 = vld [vmem:[%s3493_s0 + $0x6c] sm:$0xf0]  ;;  %v2513_v51 = vld [vmem:[%s3492_s1 + $0x160] sm:$0xff] }
   0xf   :  { %2568 = vmatpush.bf16.msra.mxu3 %v2481_v7  ;;  %1099 = vmatpush.bf16.msra.mxu1 %v2481_v7  ;;  %v1939_v40 = vld [vmem:[%s3493_s0 + $0x168] sm:$0xf]  ;;  %v2446_v43 = vld [vmem:[%s3493_s0 + $0x188] sm:$0xf0]  ;;  %v2488_v52 = vld [vmem:[%s3492_s1 + $0x98] sm:$0xff] }
  0x10   :  { %v2442_v44 = vld [vmem:[%s3493_s0 + $0x16c] sm:$0xf]  ;;  %v1795_v46 = vld [vmem:[%s3493_s0 + $0x48] sm:$0xf]  ;;  %v2496_v53 = vld [vmem:[%s3492_s1 + $0xd8] sm:$0xff]  ;;  %v1940_v54 = vor.u32 %v2446_v43, %v1939_v40 }
  0x11   :  { %v2410_v47 = vld [vmem:[%s3493_s0 + $0x68] sm:$0xf0]  ;;  %v1944_v55 = vor.u32 %v2442_v44, %v1941_v45  ;;  %v2504_v58 = vld [vmem:[%s3492_s1 + $0x118] sm:$0xff]  ;;  %v2487_v59 = vld [vmem:[%s3492_s1 + $0x90] sm:$0xff] }
  0x12   :  { %2561 = vmatpush.bf16.msra.mxu2 %v2472_v8  ;;  %1051 = vmatpush.bf16.msra.mxu0 %v2472_v8  ;;  %v2406_v48 = vld [vmem:[%s3493_s0 + $0x4c] sm:$0xf]  ;;  %v1796_v56 = vor.u32 %v2410_v47, %v1795_v46  ;;  %v2495_v60 = vld [vmem:[%s3492_s1 + $0xd0] sm:$0xff]  ;;  %v2512_v61 = vld [vmem:[%s3492_s1 + $0x158] sm:$0xff] }
  0x13   :  { %2569 = vmatpush.bf16.msra.mxu3 %v2480_v9  ;;  %1100 = vmatpush.bf16.msra.mxu1 %v2480_v9  ;;  %v1800_v57 = vor.u32 %v2406_v48, %v1797_v49  ;;  %v2503_v62 = vld [vmem:[%s3492_s1 + $0x110] sm:$0xff]  ;;  %v2486_v0 = vld [vmem:[%s3492_s1 + $0x88] sm:$0xff]  ;;  %v2485_v3 = vld [vmem:[%s3492_s1 + $0x80] sm:$0xff] }
  0x14   :  { %v2511_v63 = vld [vmem:[%s3492_s1 + $0x150] sm:$0xff]  ;;  %v2494_v1 = vld [vmem:[%s3492_s1 + $0xc8] sm:$0xff]  ;;  %v2493_v4 = vld [vmem:[%s3492_s1 + $0xc0] sm:$0xff] }
  0x15   :  { %v2502_v2 = vld [vmem:[%s3492_s1 + $0x108] sm:$0xff]  ;;  %v1975_v5 = vld [vmem:[%s3493_s0 + $0x1b0] sm:$0xf]  ;;  %v2455_v6 = vld [vmem:[%s3493_s0 + $0x1d0] sm:$0xf0] }
  0x16   :  { %2562 = vmatpush.bf16.msra.mxu2 %v2471_v10  ;;  %1052 = vmatpush.bf16.msra.mxu0 %v2471_v10  ;;  %v2451_v7 = vld [vmem:[%s3493_s0 + $0x1b4] sm:$0xf]  ;;  %v1977_v8 = vld [vmem:[%s3493_s0 + $0x1d4] sm:$0xf0]  ;;  %v1831_v9 = vld [vmem:[%s3493_s0 + $0x90] sm:$0xf] }
  0x17   :  { %2570 = vmatpush.bf16.msra.mxu3 %v2479_v11  ;;  %1101 = vmatpush.bf16.msra.mxu1 %v2479_v11  ;;  %v2419_v10 = vld [vmem:[%s3493_s0 + $0xb0] sm:$0xf0]  ;;  %v2510_v18 = vld [vmem:[%s3492_s1 + $0x148] sm:$0xff]  ;;  %v2524_v19 = vld [vmem:[%s3492_s1 + $0x1b8] sm:$0xff] }
  0x18   :  { %v2415_v11 = vld [vmem:[%s3493_s0 + $0x94] sm:$0xf]  ;;  %v1832_v16 = vor.u32 %v2419_v10, %v1831_v9  ;;  %v2532_v20 = vld [vmem:[%s3492_s1 + $0x1f8] sm:$0xff]  ;;  %v2509_v21 = vld [vmem:[%s3492_s1 + $0x140] sm:$0xff] }
  0x19   :  { %v2540_v22 = vld [vmem:[%s3492_s1 + $0x238] sm:$0xff]  ;;  %v2402_v40 = vld [vmem:[%s3493_s0 + $0x28] sm:$0xf0]  ;;  %v1775_v43 = vld [vmem:[%s3493_s0 + $0x10] sm:$0xf] }
  0x1a   :  { %2563 = vmatpush.bf16.msra.mxu2 %v2470_v12  ;;  %1053 = vmatpush.bf16.msra.mxu0 %v2470_v12  ;;  %v1833_v12 = vld [vmem:[%s3493_s0 + $0xb4] sm:$0xf0]  ;;  %v2403_v44 = vld [vmem:[%s3493_s0 + $0x30] sm:$0xf0]  ;;  %v2416_v9 = vld [vmem:[%s3493_s0 + $0x9c] sm:$0xf] }
  0x1b   :  { %2571 = vmatpush.bf16.msra.mxu3 %v2478_v13  ;;  %1102 = vmatpush.bf16.msra.mxu1 %v2478_v13  ;;  %v2501_v13 = vld [vmem:[%s3492_s1 + $0x100] sm:$0xff]  ;;  %v1836_v17 = vor.u32 %v2415_v11, %v1833_v12  ;;  %v2011_v23 = vld [vmem:[%s3493_s0 + $0x1f8] sm:$0xf]  ;;  %v2399_v45 = vld [vmem:[%s3493_s0 + $0x14] sm:$0xf]  ;;  %v1776_v49 = vor.u32 %v2403_v44, %v1775_v43 }
  0x1c   :  { %v1777_v46 = vld [vmem:[%s3493_s0 + $0x34] sm:$0xf0]  ;;  %v1841_v10 = vld [vmem:[%s3493_s0 + $0xbc] sm:$0xf0]  ;;  %v2421_v12 = vld [vmem:[%s3493_s0 + $0xc0] sm:$0xf0] }
  0x1d   :  { %v1847_v11 = vld [vmem:[%s3493_s0 + $0xa0] sm:$0xf]  ;;  %v1919_v43 = vld [vmem:[%s3493_s0 + $0x130] sm:$0xf]  ;;  %v2439_v44 = vld [vmem:[%s3493_s0 + $0x150] sm:$0xf0] }
  0x1e   :  { %2564 = vmatpush.bf16.msra.mxu2 %v2469_v14  ;;  %1054 = vmatpush.bf16.msra.mxu0 %v2469_v14  ;;  %v1976_v14 = vor.u32 %v2455_v6, %v1975_v5  ;;  %v2529_v5 = vld [vmem:[%s3492_s1 + $0x1e0] sm:$0xff] }
  0x1f   :  { %2572 = vmatpush.bf16.msra.mxu3 %v2477_v15  ;;  %1103 = vmatpush.bf16.msra.mxu1 %v2477_v15  ;;  %v1980_v15 = vor.u32 %v2451_v7, %v1977_v8  ;;  %v2537_v6 = vld [vmem:[%s3492_s1 + $0x220] sm:$0xff]  ;;  %v1839_v7 = vld [vmem:[%s3493_s0 + $0x98] sm:$0xf]  ;;  %v2420_v8 = vld [vmem:[%s3493_s0 + $0xb8] sm:$0xf0] }
  0x21   :  { %1075 = vmatmul.bf16.vlgmr.msra.gmra.mxu2 %v1904_v26  ;;  %1055 = vmatmul.bf16.vlgmr.msra.gmra.mxu0 %v1760_v28  ;;  %v2013_v26 = vld [vmem:[%s3493_s0 + $0x21c] sm:$0xf0]  ;;  %v2428_v28 = vld [vmem:[%s3493_s0 + $0xf8] sm:$0xf0] }
  0x22   :  { %1145 = vmatpush.bf16.msrb.mxu2 %v2492_v24  ;;  %1124 = vmatmul.bf16.vlgmr.msra.gmra.mxu3 %v1908_v27  ;;  %v2464_v24 = vld [vmem:[%s3493_s0 + $0x218] sm:$0xf0]  ;;  %v1867_v27 = vld [vmem:[%s3493_s0 + $0xd8] sm:$0xf] }
  0x23   :  { %1194 = vmatpush.bf16.msrb.mxu3 %v2500_v25  ;;  %1104 = vmatmul.bf16.vlgmr.msra.gmra.mxu1 %v1764_v29  ;;  %v2460_v25 = vld [vmem:[%s3493_s0 + $0x1fc] sm:$0xf] }
  0x24   :  { %1243 = vmatpush.bf16.msrb.mxu0 %v2508_v30  ;;  %1292 = vmatpush.bf16.msrb.mxu1 %v2516_v31  ;;  %v2424_v29 = vld [vmem:[%s3493_s0 + $0xdc] sm:$0xf]  ;;  %v1869_v30 = vld [vmem:[%s3493_s0 + $0xfc] sm:$0xf0]  ;;  %v2012_v31 = vor.u32 %v2464_v24, %v2011_v23  ;;  %v2429_v24 = vld [vmem:[%s3493_s0 + $0x100] sm:$0xf0] }
  0x25   :  { %v1875_v23 = vld [vmem:[%s3493_s0 + $0xe0] sm:$0xf] }
  0x26   :  { %1146 = vmatpush.bf16.msrb.mxu2 %v2491_v32  ;;  %v2016_v32 = vor.u32 %v2460_v25, %v2013_v26  ;;  %v2425_v25 = vld [vmem:[%s3493_s0 + $0xe4] sm:$0xf]  ;;  %v1877_v26 = vld [vmem:[%s3493_s0 + $0x104] sm:$0xf0] }
  0x27   :  { %1195 = vmatpush.bf16.msrb.mxu3 %v2499_v33  ;;  %v1868_v33 = vor.u32 %v2428_v28, %v1867_v27  ;;  %v1883_v27 = vld [vmem:[%s3493_s0 + $0xe8] sm:$0xf]  ;;  %v2430_v28 = vld [vmem:[%s3493_s0 + $0x108] sm:$0xf0] }
  0x28   :  { %1244 = vmatpush.bf16.msrb.mxu0 %v2507_v34  ;;  %1293 = vmatpush.bf16.msrb.mxu1 %v2515_v35  ;;  %v1872_v34 = vor.u32 %v2424_v29, %v1869_v30  ;;  %v2523_v35 = vld [vmem:[%s3492_s1 + $0x1b0] sm:$0xff]  ;;  %v2426_v29 = vld [vmem:[%s3493_s0 + $0xec] sm:$0xf] }
  0x29   :  { %v1885_v30 = vld [vmem:[%s3493_s0 + $0x10c] sm:$0xf0] }
  0x2a   :  { %1147 = vmatpush.bf16.msrb.mxu2 %v2490_v36  ;;  %v2556_v36 = vld [vmem:[%s3494_s5 + $0x38] sm:$0xff] }
  0x2b   :  { %1196 = vmatpush.bf16.msrb.mxu3 %v2498_v37  ;;  %v2531_v37 = vld [vmem:[%s3492_s1 + $0x1f0] sm:$0xff] }
  0x2c   :  { %1245 = vmatpush.bf16.msrb.mxu0 %v2506_v38  ;;  %1294 = vmatpush.bf16.msrb.mxu1 %v2514_v39  ;;  %v2539_v38 = vld [vmem:[%s3492_s1 + $0x230] sm:$0xff]  ;;  %v1767_v39 = vld [vmem:[%s3493_s0 + $0x8] sm:$0xf] }
  0x2d   :  { %v1768_v47 = vor.u32 %v2402_v40, %v1767_v39  ;;  %v1911_v39 = vld [vmem:[%s3493_s0 + $0x128] sm:$0xf]  ;;  %v2438_v40 = vld [vmem:[%s3493_s0 + $0x148] sm:$0xf0] }
  0x2e   :  { %1148 = vmatpush.bf16.msrb.mxu2 %v2489_v41  ;;  %v2398_v41 = vld [vmem:[%s3493_s0 + $0xc] sm:$0xf] }
  0x2f   :  { %1197 = vmatpush.bf16.msrb.mxu3 %v2497_v42  ;;  %v1769_v42 = vld [vmem:[%s3493_s0 + $0x2c] sm:$0xf0] }
  0x30   :  { %1246 = vmatpush.bf16.msrb.mxu0 %v2505_v50  ;;  %1295 = vmatpush.bf16.msrb.mxu1 %v2513_v51  ;;  %v1772_v48 = vor.u32 %v2398_v41, %v1769_v42  ;;  %v1780_v50 = vor.u32 %v2399_v45, %v1777_v46  ;;  %v2522_v51 = vld [vmem:[%s3492_s1 + $0x1a8] sm:$0xff]  ;;  %v1913_v42 = vld [vmem:[%s3493_s0 + $0x14c] sm:$0xf0]  ;;  %v2435_v45 = vld [vmem:[%s3493_s0 + $0x134] sm:$0xf] }
  0x31   :  { %1080 = vmatmul.bf16.gmra.mxu2 %v1940_v54  ;;  %1060 = vmatmul.bf16.gmra.mxu0 %v1796_v56  ;;  %v2538_v54 = vld [vmem:[%s3492_s1 + $0x228] sm:$0xff]  ;;  %v2411_v56 = vld [vmem:[%s3493_s0 + $0x70] sm:$0xf0]  ;;  %v1921_v46 = vld [vmem:[%s3493_s0 + $0x154] sm:$0xf0] }
  0x32   :  { %1149 = vmatpush.bf16.msrb.mxu2 %v2488_v52  ;;  %1129 = vmatmul.bf16.gmra.mxu3 %v1944_v55  ;;  %v2555_v52 = vld [vmem:[%s3494_s5 + $0x30] sm:$0xff]  ;;  %v2434_v41 = vld [vmem:[%s3493_s0 + $0x12c] sm:$0xf] }
  0x33   :  { %1198 = vmatpush.bf16.msrb.mxu3 %v2496_v53  ;;  %1109 = vmatmul.bf16.gmra.mxu1 %v1800_v57  ;;  %v2530_v53 = vld [vmem:[%s3492_s1 + $0x1e8] sm:$0xff]  ;;  %v1803_v55 = vld [vmem:[%s3493_s0 + $0x50] sm:$0xf]  ;;  %v2407_v57 = vld [vmem:[%s3493_s0 + $0x54] sm:$0xf] }
  0x34   :  { %1247 = vmatpush.bf16.msrb.mxu0 %v2504_v58  ;;  %1296 = vmatpush.bf16.msrb.mxu1 %v2512_v61  ;;  %v1805_v58 = vld [vmem:[%s3493_s0 + $0x74] sm:$0xf0]  ;;  %v2408_v61 = vld [vmem:[%s3493_s0 + $0x5c] sm:$0xf] }
  0x36   :  { %1150 = vmatpush.bf16.msrb.mxu2 %v2487_v59  ;;  %v1811_v59 = vld [vmem:[%s3493_s0 + $0x58] sm:$0xf] }
  0x37   :  { %1199 = vmatpush.bf16.msrb.mxu3 %v2495_v60  ;;  %v2412_v60 = vld [vmem:[%s3493_s0 + $0x78] sm:$0xf0] }
  0x38   :  { %1248 = vmatpush.bf16.msrb.mxu0 %v2503_v62  ;;  %1297 = vmatpush.bf16.msrb.mxu1 %v2511_v63  ;;  %v1813_v62 = vld [vmem:[%s3493_s0 + $0x7c] sm:$0xf0]  ;;  %v1804_v63 = vor.u32 %v2411_v56, %v1803_v55  ;;  %v2551_v55 = vld [vmem:[%s3494_s5 + $0x10] sm:$0xff]  ;;  %v2526_v56 = vld [vmem:[%s3492_s1 + $0x1c8] sm:$0xff] }
  0x3a   :  { %1151 = vmatpush.bf16.msrb.mxu2 %v2486_v0  ;;  %v1808_v0 = vor.u32 %v2407_v57, %v1805_v58 }
  0x3b   :  { %1200 = vmatpush.bf16.msrb.mxu3 %v2494_v1  ;;  %v1812_v1 = vor.u32 %v2412_v60, %v1811_v59 }
  0x3c   :  { %1249 = vmatpush.bf16.msrb.mxu0 %v2502_v2  ;;  %1298 = vmatpush.bf16.msrb.mxu1 %v2510_v18  ;;  %v1816_v2 = vor.u32 %v2408_v61, %v1813_v62 }
  0x3e   :  { %1152 = vmatpush.bf16.msrb.mxu2 %v2485_v3  ;;  %v2521_v3 = vld [vmem:[%s3492_s1 + $0x1a0] sm:$0xff] }
  0x3f   :  { %1201 = vmatpush.bf16.msrb.mxu3 %v2493_v4  ;;  %v2554_v4 = vld [vmem:[%s3494_s5 + $0x28] sm:$0xff] }
  0x40   :  { %1250 = vmatpush.bf16.msrb.mxu0 %v2501_v13  ;;  %1299 = vmatpush.bf16.msrb.mxu1 %v2509_v21  ;;  %v2417_v13 = vld [vmem:[%s3493_s0 + $0xa4] sm:$0xf]  ;;  %v2528_v21 = vld [vmem:[%s3492_s1 + $0x1d8] sm:$0xff] }
  0x41   :  { %1085 = vmatmul.bf16.gmra.mxu2 %v1976_v14  ;;  %1065 = vmatmul.bf16.gmra.mxu0 %v1832_v16  ;;  %v1849_v14 = vld [vmem:[%s3493_s0 + $0xc4] sm:$0xf0]  ;;  %v1844_v16 = vor.u32 %v2416_v9, %v1841_v10 }
  0x42   :  { %1134 = vmatmul.bf16.gmra.mxu3 %v1980_v15  ;;  %1341 = vmatpush.bf16.msra.mxu2 %v2524_v19  ;;  %v1840_v15 = vor.u32 %v2420_v8, %v1839_v7  ;;  %v1852_v18 = vor.u32 %v2417_v13, %v1849_v14  ;;  %v2520_v19 = vld [vmem:[%s3492_s1 + $0x198] sm:$0xff]  ;;  %v1957_v7 = vld [vmem:[%s3493_s0 + $0x19c] sm:$0xf0] }
  0x43   :  { %1114 = vmatmul.bf16.gmra.mxu1 %v1836_v17  ;;  %1390 = vmatpush.bf16.msra.mxu3 %v2532_v20  ;;  %v1848_v17 = vor.u32 %v2421_v12, %v1847_v11  ;;  %v2553_v20 = vld [vmem:[%s3494_s5 + $0x20] sm:$0xff] }
  0x44   :  { %1439 = vmatpush.bf16.msra.mxu0 %v2540_v22  ;;  %1616 = vmatpush.bf16.msra.mxu1 %v2556_v36  ;;  %v2536_v22 = vld [vmem:[%s3492_s1 + $0x218] sm:$0xff] }
  0x45   :  { %v2552_v36 = vld [vmem:[%s3494_s5 + $0x18] sm:$0xff] }
  0x46   :  { %1342 = vmatpush.bf16.msra.mxu2 %v2523_v35  ;;  %v2519_v35 = vld [vmem:[%s3492_s1 + $0x190] sm:$0xff] }
  0x47   :  { %1391 = vmatpush.bf16.msra.mxu3 %v2531_v37  ;;  %v2527_v37 = vld [vmem:[%s3492_s1 + $0x1d0] sm:$0xff] }
  0x48   :  { %1440 = vmatpush.bf16.msra.mxu0 %v2539_v38  ;;  %1617 = vmatpush.bf16.msra.mxu1 %v2555_v52  ;;  %v2535_v38 = vld [vmem:[%s3492_s1 + $0x210] sm:$0xff] }
  0x4a   :  { %1343 = vmatpush.bf16.msra.mxu2 %v2522_v51 }
  0x4b   :  { %1392 = vmatpush.bf16.msra.mxu3 %v2530_v53 }
  0x4c   :  { %1441 = vmatpush.bf16.msra.mxu0 %v2538_v54  ;;  %1618 = vmatpush.bf16.msra.mxu1 %v2554_v4  ;;  %v2518_v54 = vld [vmem:[%s3492_s1 + $0x188] sm:$0xff]  ;;  %v1955_v4 = vld [vmem:[%s3493_s0 + $0x178] sm:$0xf] }
  0x4e   :  { %1344 = vmatpush.bf16.msra.mxu2 %v2521_v3  ;;  %v1949_v3 = vld [vmem:[%s3493_s0 + $0x194] sm:$0xf0] }
  0x4f   :  { %1393 = vmatpush.bf16.msra.mxu3 %v2529_v5  ;;  %v2448_v5 = vld [vmem:[%s3493_s0 + $0x198] sm:$0xf0] }
  0x50   :  { %1442 = vmatpush.bf16.msra.mxu0 %v2537_v6  ;;  %1619 = vmatpush.bf16.msra.mxu1 %v2553_v20  ;;  %v2444_v6 = vld [vmem:[%s3493_s0 + $0x17c] sm:$0xf]  ;;  %v1956_v13 = vor.u32 %v2448_v5, %v1955_v4  ;;  %v2525_v20 = vld [vmem:[%s3492_s1 + $0x1c0] sm:$0xff] }
  0x51   :  { %1090 = vmatmul.bf16.gmra.mxu2 %v2012_v31  ;;  %1070 = vmatmul.bf16.gmra.mxu0 %v1868_v33  ;;  %v1876_v31 = vor.u32 %v2429_v24, %v1875_v23  ;;  %v1884_v33 = vor.u32 %v2430_v28, %v1883_v27  ;;  %v1960_v14 = vor.u32 %v2444_v6, %v1957_v7  ;;  %v2533_v27 = vld [vmem:[%s3492_s1 + $0x200] sm:$0xff]  ;;  %v1983_v28 = vld [vmem:[%s3493_s0 + $0x1b8] sm:$0xf] }
  0x52   :  { %1139 = vmatmul.bf16.gmra.mxu3 %v2016_v32  ;;  %1345 = vmatpush.bf16.msra.mxu2 %v2520_v19  ;;  %v1880_v32 = vor.u32 %v2425_v25, %v1877_v26  ;;  %v2550_v19 = vld [vmem:[%s3494_s5 + $0x8] sm:$0xff] }
  0x53   :  { %1119 = vmatmul.bf16.gmra.mxu1 %v1872_v34  ;;  %1394 = vmatpush.bf16.msra.mxu3 %v2528_v21  ;;  %v1888_v34 = vor.u32 %v2426_v29, %v1885_v30  ;;  %v2456_v29 = vld [vmem:[%s3493_s0 + $0x1d8] sm:$0xf0] }
  0x54   :  { %1443 = vmatpush.bf16.msra.mxu0 %v2536_v22  ;;  %1620 = vmatpush.bf16.msra.mxu1 %v2552_v36  ;;  %v2452_v30 = vld [vmem:[%s3493_s0 + $0x1bc] sm:$0xf] }
  0x56   :  { %1346 = vmatpush.bf16.msra.mxu2 %v2519_v35  ;;  %v1993_v35 = vld [vmem:[%s3493_s0 + $0x1e4] sm:$0xf0] }
  0x57   :  { %1395 = vmatpush.bf16.msra.mxu3 %v2527_v37 }
  0x58   :  { %1444 = vmatpush.bf16.msra.mxu0 %v2535_v38  ;;  %1621 = vmatpush.bf16.msra.mxu1 %v2551_v55  ;;  %v2465_v55 = vld [vmem:[%s3493_s0 + $0x220] sm:$0xf0] }
  0x5a   :  { %1347 = vmatpush.bf16.msra.mxu2 %v2518_v54  ;;  %v2019_v54 = vld [vmem:[%s3493_s0 + $0x200] sm:$0xf] }
  0x5b   :  { %1396 = vmatpush.bf16.msra.mxu3 %v2526_v56  ;;  %v2461_v56 = vld [vmem:[%s3493_s0 + $0x204] sm:$0xf] }
  0x5c   :  { %1622 = vmatpush.bf16.msra.mxu1 %v2550_v19  ;;  %v2404_v19 = vld [vmem:[%s3493_s0 + $0x38] sm:$0xf0] }
  0x5f   :  { %1397 = vmatpush.bf16.msra.mxu3 %v2525_v20  ;;  %v2400_v20 = vld [vmem:[%s3493_s0 + $0x1c] sm:$0xf] }
  0x61   :  { %1153 = vmatmul.bf16.vlgmr.msrb.gmra.mxu2 %v1768_v47  ;;  %1251 = vmatmul.bf16.vlgmr.msrb.gmra.mxu0 %v1776_v49  ;;  %v1912_v47 = vor.u32 %v2438_v40, %v1911_v39  ;;  %v1920_v49 = vor.u32 %v2439_v44, %v1919_v43  ;;  %v1984_v39 = vor.u32 %v2456_v29, %v1983_v28 }
  0x62   :  { %1202 = vmatmul.bf16.vlgmr.msrb.gmra.mxu3 %v1772_v48  ;;  %v1916_v48 = vor.u32 %v2434_v41, %v1913_v42 }
  0x63   :  { %1300 = vmatmul.bf16.vlgmr.msrb.gmra.mxu1 %v1780_v50  ;;  %v1924_v50 = vor.u32 %v2435_v45, %v1921_v46  ;;  %v2549_v46 = vld [vmem:[%s3494_s5] sm:$0xff] }
  0x64   :  { %1623 = vmatpush.bf16.msra.mxu1 %v2549_v46  ;;  %v2409_v46 = vld [vmem:[%s3493_s0 + $0x64] sm:$0xf] }
  0x71   :  { %1158 = vmatmul.bf16.gmra.mxu2 %v1804_v63  ;;  %1256 = vmatmul.bf16.gmra.mxu0 %v1812_v1  ;;  %v2534_v63 = vld [vmem:[%s3492_s1 + $0x208] sm:$0xff]  ;;  %v2447_v1 = vld [vmem:[%s3493_s0 + $0x190] sm:$0xf0] }
  0x72   :  { %1207 = vmatmul.bf16.gmra.mxu3 %v1808_v0  ;;  %v1947_v0 = vld [vmem:[%s3493_s0 + $0x170] sm:$0xf]  ;;  %1445 = vmatpush.bf16.msra.mxu0 %v2534_v63 }
  0x73   :  { %1305 = vmatmul.bf16.gmra.mxu1 %v1816_v2  ;;  %v2443_v2 = vld [vmem:[%s3493_s0 + $0x174] sm:$0xf]  ;;  %v1948_v11 = vor.u32 %v2447_v1, %v1947_v0  ;;  %v2029_v63 = vld [vmem:[%s3493_s0 + $0x22c] sm:$0xf0] }
  0x74   :  { %v1952_v12 = vor.u32 %v2443_v2, %v1949_v3  ;;  %v2020_v3 = vor.u32 %v2465_v55, %v2019_v54 }
  0x76   :  { %1446 = vmatpush.bf16.msra.mxu0 %v2533_v27 }
  0x81   :  { %1163 = vmatmul.bf16.gmra.mxu2 %v1840_v15  ;;  %1261 = vmatmul.bf16.gmra.mxu0 %v1848_v17 }
  0x82   :  { %1212 = vmatmul.bf16.gmra.mxu3 %v1844_v16 }
  0x83   :  { %1310 = vmatmul.bf16.gmra.mxu1 %v1852_v18  ;;  %v2517_v18 = vld [vmem:[%s3492_s1 + $0x180] sm:$0xff] }
  0x84   :  { %1348 = vmatpush.bf16.msra.mxu2 %v2517_v18  ;;  %v1783_v18 = vld [vmem:[%s3493_s0 + $0x18] sm:$0xf] }
  0x85   :  { %v1784_v29 = vor.u32 %v2404_v19, %v1783_v18  ;;  %v1863_v19 = vld [vmem:[%s3493_s0 + $0xb0] sm:$0xf] }
  0x91   :  { %1168 = vmatmul.bf16.gmra.mxu2 %v1876_v31  ;;  %1266 = vmatmul.bf16.gmra.mxu0 %v1884_v33  ;;  %v1985_v31 = vld [vmem:[%s3493_s0 + $0x1dc] sm:$0xf0]  ;;  %v2457_v33 = vld [vmem:[%s3493_s0 + $0x1e0] sm:$0xf0] }
  0x92   :  { %1217 = vmatmul.bf16.gmra.mxu3 %v1880_v32  ;;  %v1991_v32 = vld [vmem:[%s3493_s0 + $0x1c0] sm:$0xf]  ;;  %v1988_v40 = vor.u32 %v2452_v30, %v1985_v31 }
  0x93   :  { %1315 = vmatmul.bf16.gmra.mxu1 %v1888_v34  ;;  %v2453_v34 = vld [vmem:[%s3493_s0 + $0x1c4] sm:$0xf]  ;;  %v1992_v41 = vor.u32 %v2457_v33, %v1991_v32 }
  0x94   :  { %v1996_v42 = vor.u32 %v2453_v34, %v1993_v35  ;;  %v2541_v32 = vld [vmem:[%s3495_s4] sm:$0xff] }
  0x9e   :  { %v1056_v51 = vpop.f32.mrf.mxu0 }
  0xa0   :  { %v1105_v52 = vpop.f32.mrf.mxu1 }
  0xa1   :  { %v3039_v53 = vadd.f32 %v1105_v52, %v1056_v51  ;;  %1173 = vmatmul.bf16.gmra.mxu2 %v1912_v47  ;;  %1271 = vmatmul.bf16.gmra.mxu0 %v1920_v49 }
  0xa2   :  { %1222 = vmatmul.bf16.gmra.mxu3 %v1916_v48 }
  0xa3   :  { %1320 = vmatmul.bf16.gmra.mxu1 %v1924_v50 }
  0xa4   :  { %v1076_v57 = vpop.f32.mrf.mxu2 }
  0xa5   :  { %v1125_v58 = vpop.f32.mrf.mxu3 }
  0xa6   :  { %v3050_v59 = vadd.f32 %v1125_v58, %v1076_v57  ;;  %v1058_v60 = vpop.f32.mrf.mxu0  ;;  %v2021_v57 = vld [vmem:[%s3493_s0 + $0x224] sm:$0xf0] }
  0xa7   :  { %v2027_v58 = vld [vmem:[%s3493_s0 + $0x208] sm:$0xf]  ;;  %v2024_v4 = vor.u32 %v2461_v56, %v2021_v57 }
  0xa8   :  { %v1107_v61 = vpop.f32.mrf.mxu1 }
  0xa9   :  { %v3052_v62 = vadd.f32 %v1107_v61, %v1058_v60  ;;  %v2466_v60 = vld [vmem:[%s3493_s0 + $0x228] sm:$0xf0] }
  0xaa   :  { %v2462_v61 = vld [vmem:[%s3493_s0 + $0x20c] sm:$0xf]  ;;  %v2028_v5 = vor.u32 %v2466_v60, %v2027_v58 }
  0xab   :  { %v2032_v6 = vor.u32 %v2462_v61, %v2029_v63  ;;  %v2542_v60 = vld [vmem:[%s3495_s4 + $0x8] sm:$0xff] }
  0xac   :  { %v1078_v8 = vpop.f32.mrf.mxu2 }
  0xad   :  { %v1127_v9 = vpop.f32.mrf.mxu3 }
  0xae   :  { %v3081_v10 = vadd.f32 %v1127_v9, %v1078_v8  ;;  %v1061_v15 = vpop.f32.mrf.mxu0 }
  0xb0   :  { %v1110_v16 = vpop.f32.mrf.mxu1 }
  0xb1   :  { %v3083_v17 = vadd.f32 %v1110_v16, %v1061_v15  ;;  %1178 = vmatmul.bf16.gmra.mxu2 %v1948_v11  ;;  %1276 = vmatmul.bf16.gmra.mxu0 %v1956_v13 }
  0xb2   :  { %1227 = vmatmul.bf16.gmra.mxu3 %v1952_v12 }
  0xb3   :  { %1325 = vmatmul.bf16.gmra.mxu1 %v1960_v14 }
  0xb4   :  { %v1081_v21 = vpop.f32.mrf.mxu2 }
  0xb5   :  { %v1130_v22 = vpop.f32.mrf.mxu3 }
  0xb6   :  { %v3094_v23 = vadd.f32 %v1130_v22, %v1081_v21  ;;  %v1063_v24 = vpop.f32.mrf.mxu0  ;;  %v1785_v21 = vld [vmem:[%s3493_s0 + $0x3c] sm:$0xf0] }
  0xb7   :  { %v1791_v22 = vld [vmem:[%s3493_s0 + $0x20] sm:$0xf]  ;;  %v1788_v30 = vor.u32 %v2400_v20, %v1785_v21  ;;  %v2423_v20 = vld [vmem:[%s3493_s0 + $0xd0] sm:$0xf0] }
  0xb8   :  { %v1112_v25 = vpop.f32.mrf.mxu1 }
  0xb9   :  { %v3096_v26 = vadd.f32 %v1112_v25, %v1063_v24  ;;  %v2405_v24 = vld [vmem:[%s3493_s0 + $0x40] sm:$0xf0] }
  0xba   :  { %v1792_v31 = vor.u32 %v2405_v24, %v1791_v22 }
  0xbc   :  { %v1083_v36 = vpop.f32.mrf.mxu2 }
  0xbd   :  { %v1132_v37 = vpop.f32.mrf.mxu3 }
  0xbe   :  { %v3125_v38 = vadd.f32 %v1132_v37, %v1083_v36  ;;  %v1066_v43 = vpop.f32.mrf.mxu0 }
  0xc0   :  { %v1115_v44 = vpop.f32.mrf.mxu1 }
  0xc1   :  { %v3127_v45 = vadd.f32 %v1115_v44, %v1066_v43  ;;  %1183 = vmatmul.bf16.gmra.mxu2 %v1984_v39  ;;  %1281 = vmatmul.bf16.gmra.mxu0 %v1992_v41  ;;  %v1819_v43 = vld [vmem:[%s3493_s0 + $0x60] sm:$0xf]  ;;  %v2413_v44 = vld [vmem:[%s3493_s0 + $0x80] sm:$0xf0] }
  0xc2   :  { %1232 = vmatmul.bf16.gmra.mxu3 %v1988_v40  ;;  %v1820_v56 = vor.u32 %v2413_v44, %v1819_v43  ;;  %v1891_v43 = vld [vmem:[%s3493_s0 + $0xf0] sm:$0xf]  ;;  %v2431_v44 = vld [vmem:[%s3493_s0 + $0x110] sm:$0xf0] }
  0xc3   :  { %1330 = vmatmul.bf16.gmra.mxu1 %v1996_v42 }
  0xc4   :  { %v1086_v47 = vpop.f32.mrf.mxu2 }
  0xc5   :  { %v1135_v48 = vpop.f32.mrf.mxu3 }
  0xc6   :  { %v3132_v49 = vadd.f32 %v1135_v48, %v1086_v47  ;;  %v1068_v50 = vpop.f32.mrf.mxu0  ;;  %v1827_v48 = vld [vmem:[%s3493_s0 + $0x68] sm:$0xf] }
  0xc8   :  { %v1117_v51 = vpop.f32.mrf.mxu1 }
  0xc9   :  { %v3134_v52 = vadd.f32 %v1117_v51, %v1068_v50  ;;  %v2414_v50 = vld [vmem:[%s3493_s0 + $0x88] sm:$0xf0] }
  0xca   :  { %v1828_v58 = vor.u32 %v2414_v50, %v1827_v48  ;;  %v1899_v48 = vld [vmem:[%s3493_s0 + $0xf8] sm:$0xf]  ;;  %v2432_v50 = vld [vmem:[%s3493_s0 + $0x118] sm:$0xf0] }
  0xcc   :  { %v1088_v0 = vpop.f32.mrf.mxu2 }
  0xcd   :  { %v1137_v1 = vpop.f32.mrf.mxu3 }
  0xce   :  { %v3160_v2 = vadd.f32 %v1137_v1, %v1088_v0  ;;  %v1071_v7 = vpop.f32.mrf.mxu0 }
  0xd0   :  { %v1120_v8 = vpop.f32.mrf.mxu1 }
  0xd1   :  { %v3162_v9 = vadd.f32 %v1120_v8, %v1071_v7  ;;  %1188 = vmatmul.bf16.gmra.mxu2 %v2020_v3  ;;  %1286 = vmatmul.bf16.gmra.mxu0 %v2028_v5 }
  0xd2   :  { %1237 = vmatmul.bf16.gmra.mxu3 %v2024_v4 }
  0xd3   :  { %1335 = vmatmul.bf16.gmra.mxu1 %v2032_v6 }
  0xd4   :  { %v1091_v11 = vpop.f32.mrf.mxu2 }
  0xd5   :  { %v1140_v12 = vpop.f32.mrf.mxu3 }
  0xd6   :  { %v3164_v13 = vadd.f32 %v1140_v12, %v1091_v11  ;;  %v1073_v14 = vpop.f32.mrf.mxu0  ;;  %v1855_v12 = vld [vmem:[%s3493_s0 + $0xa8] sm:$0xf] }
  0xd8   :  { %v1122_v15 = vpop.f32.mrf.mxu1 }
  0xd9   :  { %v3166_v16 = vadd.f32 %v1122_v15, %v1073_v14  ;;  %v2422_v14 = vld [vmem:[%s3493_s0 + $0xc8] sm:$0xf0] }
  0xda   :  { %v2418_v15 = vld [vmem:[%s3493_s0 + $0xac] sm:$0xf] }
  0xdc   :  { %v1093_v25 = vpop.f32.mrf.mxu2 }
  0xdd   :  { %v1142_v27 = vpop.f32.mrf.mxu3 }
  0xde   :  { %v3186_v28 = vadd.f32 %v1142_v27, %v1093_v25  ;;  %v1252_v33 = vpop.f32.mrf.mxu0  ;;  %v1856_v25 = vor.u32 %v2422_v14, %v1855_v12  ;;  %v1927_v12 = vld [vmem:[%s3493_s0 + $0x138] sm:$0xf]  ;;  %v2440_v14 = vld [vmem:[%s3493_s0 + $0x158] sm:$0xf0] }
  0xe0   :  { %v1301_v34 = vpop.f32.mrf.mxu1 }
  0xe1   :  { %1349 = vmatmul.bf16.vlgmr.msra.gmra.mxu2 %v1784_v29  ;;  %1447 = vmatmul.bf16.vlgmr.msra.gmra.mxu0 %v1792_v31  ;;  %v1864_v29 = vor.u32 %v2423_v20, %v1863_v19  ;;  %v1935_v19 = vld [vmem:[%s3493_s0 + $0x140] sm:$0xf]  ;;  %v2441_v20 = vld [vmem:[%s3493_s0 + $0x160] sm:$0xf0] }
  0xe2   :  { %1398 = vmatmul.bf16.vlgmr.msra.gmra.mxu3 %v1788_v30  ;;  %v2543_v30 = vld [vmem:[%s3495_s4 + $0x10] sm:$0xff] }
  0xe3   :  { %1624 = vmatmul.bf16.vlgmr.msra.gmra.mxu1 %v2541_v32 }
  0xe4   :  { %v1154_v35 = vpop.f32.mrf.mxu2 }
  0xe5   :  { %v1203_v36 = vpop.f32.mrf.mxu3  ;;  %v1155_v37 = vadd.f32 %v1154_v35, %v3039_v53  ;;  %v1821_v53 = vld [vmem:[%s3493_s0 + $0x84] sm:$0xf0] }
  0xe6   :  { %v1254_v40 = vpop.f32.mrf.mxu0  ;;  %v1824_v57 = vor.u32 %v2409_v46, %v1821_v53  ;;  %v2427_v46 = vld [vmem:[%s3493_s0 + $0xf4] sm:$0xf] }
  0xe7   :  { %v1204_v39 = vadd.f32 %v1203_v36, %v1155_v37 }
  0xe8   :  { %v1303_v41 = vpop.f32.mrf.mxu1 }
  0xe9   :  { %v1253_v42 = vadd.f32 %v1252_v33, %v1204_v39 }
  0xeb   :  { %v3204_v47 = vadd.f32 %v1301_v34, %v1253_v42 }
  0xec   :  { %v1156_v51 = vpop.f32.mrf.mxu2 }
  0xed   :  { %v1205_v54 = vpop.f32.mrf.mxu3  ;;  %v1157_v55 = vadd.f32 %v1156_v51, %v3052_v62 }
  0xee   :  { %v1257_v63 = vpop.f32.mrf.mxu0 }
  0xef   :  { %v1206_v61 = vadd.f32 %v1205_v54, %v1157_v55 }
  0xf0   :  { %v1306_v0 = vpop.f32.mrf.mxu1 }
  0xf1   :  { %v1255_v1 = vadd.f32 %v1254_v40, %v1206_v61  ;;  %1354 = vmatmul.bf16.gmra.mxu2 %v1820_v56  ;;  %1452 = vmatmul.bf16.gmra.mxu0 %v1828_v58  ;;  %v1892_v56 = vor.u32 %v2431_v44, %v1891_v43  ;;  %v1900_v58 = vor.u32 %v2432_v50, %v1899_v48  ;;  %v1963_v43 = vld [vmem:[%s3493_s0 + $0x180] sm:$0xf]  ;;  %v2449_v44 = vld [vmem:[%s3493_s0 + $0x1a0] sm:$0xf0]  ;;  %v1971_v48 = vld [vmem:[%s3493_s0 + $0x188] sm:$0xf] }
  0xf2   :  { %1403 = vmatmul.bf16.gmra.mxu3 %v1824_v57  ;;  %v2450_v50 = vld [vmem:[%s3493_s0 + $0x1a8] sm:$0xf0] }
  0xf3   :  { %1629 = vmatmul.bf16.gmra.mxu1 %v2542_v60  ;;  %v3216_v3 = vadd.f32 %v1303_v41, %v1255_v1  ;;  %v2544_v60 = vld [vmem:[%s3495_s4 + $0x18] sm:$0xff] }
  0xf4   :  { %v1159_v4 = vpop.f32.mrf.mxu2 }
  0xf5   :  { %v1208_v5 = vpop.f32.mrf.mxu3  ;;  %v1160_v62 = vadd.f32 %v1159_v4, %v3083_v17  ;;  %v1857_v17 = vld [vmem:[%s3493_s0 + $0xcc] sm:$0xf0] }
  0xf6   :  { %v1259_v7 = vpop.f32.mrf.mxu0  ;;  %v1860_v27 = vor.u32 %v2418_v15, %v1857_v17  ;;  %v2436_v15 = vld [vmem:[%s3493_s0 + $0x13c] sm:$0xf] }
  0xf7   :  { %v1209_v6 = vadd.f32 %v1208_v5, %v1160_v62 }
  0xf8   :  { %v1308_v8 = vpop.f32.mrf.mxu1 }
  0xf9   :  { %v1258_v11 = vadd.f32 %v1257_v63, %v1209_v6 }
  0xfb   :  { %v3231_v18 = vadd.f32 %v1306_v0, %v1258_v11 }
  0xfc   :  { %v1161_v21 = vpop.f32.mrf.mxu2 }
  0xfd   :  { %v1210_v22 = vpop.f32.mrf.mxu3  ;;  %v1162_v24 = vadd.f32 %v1161_v21, %v3096_v26 }
  0xfe   :  { %v1262_v32 = vpop.f32.mrf.mxu0 }
  0xff   :  { %v1211_v31 = vadd.f32 %v1210_v22, %v1162_v24 }
 0x100   :  { %v1311_v33 = vpop.f32.mrf.mxu1 }
 0x101   :  { %v1260_v34 = vadd.f32 %v1259_v7, %v1211_v31  ;;  %1359 = vmatmul.bf16.gmra.mxu2 %v1856_v25  ;;  %1457 = vmatmul.bf16.gmra.mxu0 %v1864_v29  ;;  %v1928_v25 = vor.u32 %v2440_v14, %v1927_v12  ;;  %v1936_v29 = vor.u32 %v2441_v20, %v1935_v19  ;;  %v1999_v12 = vld [vmem:[%s3493_s0 + $0x1c8] sm:$0xf]  ;;  %v2458_v14 = vld [vmem:[%s3493_s0 + $0x1e8] sm:$0xf0]  ;;  %v2007_v19 = vld [vmem:[%s3493_s0 + $0x1d0] sm:$0xf] }
 0x102   :  { %1408 = vmatmul.bf16.gmra.mxu3 %v1860_v27  ;;  %v2459_v20 = vld [vmem:[%s3493_s0 + $0x1f0] sm:$0xf0] }
 0x103   :  { %1634 = vmatmul.bf16.gmra.mxu1 %v2543_v30  ;;  %v3243_v35 = vadd.f32 %v1308_v8, %v1260_v34  ;;  %v2545_v30 = vld [vmem:[%s3495_s4 + $0x20] sm:$0xff] }
 0x104   :  { %v1164_v36 = vpop.f32.mrf.mxu2 }
 0x105   :  { %v1213_v37 = vpop.f32.mrf.mxu3  ;;  %v1165_v26 = vadd.f32 %v1164_v36, %v3127_v45  ;;  %v1893_v45 = vld [vmem:[%s3493_s0 + $0x114] sm:$0xf0] }
 0x106   :  { %v1264_v40 = vpop.f32.mrf.mxu0  ;;  %v1896_v57 = vor.u32 %v2427_v46, %v1893_v45  ;;  %v2445_v46 = vld [vmem:[%s3493_s0 + $0x184] sm:$0xf] }
 0x107   :  { %v1214_v39 = vadd.f32 %v1213_v37, %v1165_v26 }
 0x108   :  { %v1313_v41 = vpop.f32.mrf.mxu1 }
 0x109   :  { %v1263_v42 = vadd.f32 %v1262_v32, %v1214_v39 }
 0x10b   :  { %v3258_v53 = vadd.f32 %v1311_v33, %v1263_v42 }
 0x10c   :  { %v1166_v51 = vpop.f32.mrf.mxu2 }
 0x10d   :  { %v1215_v54 = vpop.f32.mrf.mxu3  ;;  %v1167_v55 = vadd.f32 %v1166_v51, %v3134_v52 }
 0x10e   :  { %v1267_v63 = vpop.f32.mrf.mxu0 }
 0x10f   :  { %v1216_v61 = vadd.f32 %v1215_v54, %v1167_v55 }
 0x110   :  { %v1316_v0 = vpop.f32.mrf.mxu1 }
 0x111   :  { %v1265_v1 = vadd.f32 %v1264_v40, %v1216_v61  ;;  %1364 = vmatmul.bf16.gmra.mxu2 %v1892_v56  ;;  %1462 = vmatmul.bf16.gmra.mxu0 %v1900_v58  ;;  %v1964_v56 = vor.u32 %v2449_v44, %v1963_v43  ;;  %v1972_v58 = vor.u32 %v2450_v50, %v1971_v48  ;;  %v2035_v43 = vld [vmem:[%s3493_s0 + $0x210] sm:$0xf]  ;;  %v2467_v44 = vld [vmem:[%s3493_s0 + $0x230] sm:$0xf0]  ;;  %v2043_v48 = vld [vmem:[%s3493_s0 + $0x218] sm:$0xf] }
 0x112   :  { %1413 = vmatmul.bf16.gmra.mxu3 %v1896_v57  ;;  %v2468_v50 = vld [vmem:[%s3493_s0 + $0x238] sm:$0xf0] }
 0x113   :  { %1639 = vmatmul.bf16.gmra.mxu1 %v2544_v60  ;;  %v3270_v4 = vadd.f32 %v1313_v41, %v1265_v1  ;;  %v2546_v60 = vld [vmem:[%s3495_s4 + $0x28] sm:$0xff] }
 0x114   :  { %v1169_v5 = vpop.f32.mrf.mxu2 }
 0x115   :  { %v1218_v62 = vpop.f32.mrf.mxu3  ;;  %v1170_v52 = vadd.f32 %v1169_v5, %v3162_v9  ;;  %v1929_v9 = vld [vmem:[%s3493_s0 + $0x15c] sm:$0xf0] }
 0x116   :  { %v1269_v7 = vpop.f32.mrf.mxu0  ;;  %v1932_v27 = vor.u32 %v2436_v15, %v1929_v9  ;;  %v2454_v15 = vld [vmem:[%s3493_s0 + $0x1cc] sm:$0xf] }
 0x117   :  { %v1219_v6 = vadd.f32 %v1218_v62, %v1170_v52 }
 0x118   :  { %v1318_v8 = vpop.f32.mrf.mxu1 }
 0x119   :  { %v1268_v11 = vadd.f32 %v1267_v63, %v1219_v6 }
 0x11b   :  { %v3285_v17 = vadd.f32 %v1316_v0, %v1268_v11 }
 0x11c   :  { %v1171_v21 = vpop.f32.mrf.mxu2 }
 0x11d   :  { %v1220_v22 = vpop.f32.mrf.mxu3  ;;  %v1172_v24 = vadd.f32 %v1171_v21, %v3166_v16 }
 0x11e   :  { %v1272_v32 = vpop.f32.mrf.mxu0 }
 0x11f   :  { %v1221_v31 = vadd.f32 %v1220_v22, %v1172_v24 }
 0x120   :  { %v1321_v33 = vpop.f32.mrf.mxu1 }
 0x121   :  { %v1270_v34 = vadd.f32 %v1269_v7, %v1221_v31  ;;  %1369 = vmatmul.bf16.gmra.mxu2 %v1928_v25  ;;  %1467 = vmatmul.bf16.gmra.mxu0 %v1936_v29  ;;  %v2000_v25 = vor.u32 %v2458_v14, %v1999_v12  ;;  %v2008_v29 = vor.u32 %v2459_v20, %v2007_v19 }
 0x122   :  { %1418 = vmatmul.bf16.gmra.mxu3 %v1932_v27 }
 0x123   :  { %1644 = vmatmul.bf16.gmra.mxu1 %v2545_v30  ;;  %v3297_v36 = vadd.f32 %v1318_v8, %v1270_v34  ;;  %v2547_v30 = vld [vmem:[%s3495_s4 + $0x30] sm:$0xff] }
 0x124   :  { %v1174_v37 = vpop.f32.mrf.mxu2 }
 0x125   :  { %v1223_v26 = vpop.f32.mrf.mxu3  ;;  %v1175_v16 = vadd.f32 %v1174_v37, %v3050_v59  ;;  %v1965_v59 = vld [vmem:[%s3493_s0 + $0x1a4] sm:$0xf0] }
 0x126   :  { %v1274_v40 = vpop.f32.mrf.mxu0  ;;  %v1968_v57 = vor.u32 %v2445_v46, %v1965_v59  ;;  %v2463_v46 = vld [vmem:[%s3493_s0 + $0x214] sm:$0xf] }
 0x127   :  { %v1224_v39 = vadd.f32 %v1223_v26, %v1175_v16 }
 0x128   :  { %v1323_v41 = vpop.f32.mrf.mxu1 }
 0x129   :  { %v1273_v42 = vadd.f32 %v1272_v32, %v1224_v39 }
 0x12b   :  { %v3312_v45 = vadd.f32 %v1321_v33, %v1273_v42 }
 0x12c   :  { %v1176_v51 = vpop.f32.mrf.mxu2 }
 0x12d   :  { %v1225_v54 = vpop.f32.mrf.mxu3  ;;  %v1177_v55 = vadd.f32 %v1176_v51, %v3081_v10 }
 0x12e   :  { %v1277_v63 = vpop.f32.mrf.mxu0 }
 0x12f   :  { %v1226_v61 = vadd.f32 %v1225_v54, %v1177_v55 }
 0x130   :  { %v1326_v0 = vpop.f32.mrf.mxu1 }
 0x131   :  { %v1275_v1 = vadd.f32 %v1274_v40, %v1226_v61  ;;  %1374 = vmatmul.bf16.gmra.mxu2 %v1964_v56  ;;  %1472 = vmatmul.bf16.gmra.mxu0 %v1972_v58  ;;  %v2036_v56 = vor.u32 %v2467_v44, %v2035_v43  ;;  %v2044_v58 = vor.u32 %v2468_v50, %v2043_v48 }
 0x132   :  { %1423 = vmatmul.bf16.gmra.mxu3 %v1968_v57 }
 0x133   :  { %1649 = vmatmul.bf16.gmra.mxu1 %v2546_v60  ;;  %v3324_v5 = vadd.f32 %v1323_v41, %v1275_v1  ;;  %v2548_v60 = vld [vmem:[%s3495_s4 + $0x38] sm:$0xff] }
 0x134   :  { %v1179_v62 = vpop.f32.mrf.mxu2 }
 0x135   :  { %v1228_v52 = vpop.f32.mrf.mxu3  ;;  %v1180_v10 = vadd.f32 %v1179_v62, %v3094_v23  ;;  %v2001_v23 = vld [vmem:[%s3493_s0 + $0x1ec] sm:$0xf0] }
 0x136   :  { %v1279_v7 = vpop.f32.mrf.mxu0  ;;  %v2004_v27 = vor.u32 %v2454_v15, %v2001_v23 }
 0x137   :  { %v1229_v6 = vadd.f32 %v1228_v52, %v1180_v10 }
 0x138   :  { %v1328_v8 = vpop.f32.mrf.mxu1 }
 0x139   :  { %v1278_v11 = vadd.f32 %v1277_v63, %v1229_v6 }
 0x13b   :  { %v3339_v9 = vadd.f32 %v1326_v0, %v1278_v11 }
 0x13c   :  { %v1181_v21 = vpop.f32.mrf.mxu2 }
 0x13d   :  { %v1230_v22 = vpop.f32.mrf.mxu3  ;;  %v1182_v24 = vadd.f32 %v1181_v21, %v3125_v38 }
 0x13e   :  { %v1282_v32 = vpop.f32.mrf.mxu0 }
 0x13f   :  { %v1231_v31 = vadd.f32 %v1230_v22, %v1182_v24 }
 0x140   :  { %v1331_v33 = vpop.f32.mrf.mxu1 }
 0x141   :  { %v1280_v34 = vadd.f32 %v1279_v7, %v1231_v31  ;;  %1379 = vmatmul.bf16.gmra.mxu2 %v2000_v25  ;;  %1477 = vmatmul.bf16.gmra.mxu0 %v2008_v29 }
 0x142   :  { %1428 = vmatmul.bf16.gmra.mxu3 %v2004_v27 }
 0x143   :  { %1654 = vmatmul.bf16.gmra.mxu1 %v2547_v30  ;;  %v3351_v37 = vadd.f32 %v1328_v8, %v1280_v34  ;;  %v3390_v30 = vld [vmem:[%s3496_s2] ss:$0 sm:$0xff] }
 0x144   :  { %v1184_v26 = vpop.f32.mrf.mxu2 }
 0x145   :  { %v1233_v16 = vpop.f32.mrf.mxu3  ;;  %v1185_v38 = vadd.f32 %v1184_v26, %v3132_v49  ;;  %v2037_v49 = vld [vmem:[%s3493_s0 + $0x234] sm:$0xf0] }
 0x146   :  { %v1284_v40 = vpop.f32.mrf.mxu0  ;;  %v2040_v57 = vor.u32 %v2463_v46, %v2037_v49 }
 0x147   :  { %v1234_v39 = vadd.f32 %v1233_v16, %v1185_v38 }
 0x148   :  { %v1333_v41 = vpop.f32.mrf.mxu1 }
 0x149   :  { %v1283_v42 = vadd.f32 %v1282_v32, %v1234_v39 }
 0x14b   :  { %v3366_v59 = vadd.f32 %v1331_v33, %v1283_v42 }
 0x14c   :  { %v1186_v51 = vpop.f32.mrf.mxu2 }
 0x14d   :  { %v1235_v54 = vpop.f32.mrf.mxu3  ;;  %v1187_v55 = vadd.f32 %v1186_v51, %v3160_v2 }
 0x14e   :  { %v1287_v63 = vpop.f32.mrf.mxu0 }
 0x14f   :  { %v1236_v61 = vadd.f32 %v1235_v54, %v1187_v55 }
 0x150   :  { %v1336_v0 = vpop.f32.mrf.mxu1 }
 0x151   :  { %v1285_v1 = vadd.f32 %v1284_v40, %v1236_v61  ;;  %1384 = vmatmul.bf16.gmra.mxu2 %v2036_v56  ;;  %1482 = vmatmul.bf16.gmra.mxu0 %v2044_v58 }
 0x152   :  { %1433 = vmatmul.bf16.gmra.mxu3 %v2040_v57 }
 0x153   :  { %1659 = vmatmul.bf16.gmra.mxu1 %v2548_v60  ;;  %v3378_v62 = vadd.f32 %v1333_v41, %v1285_v1 }
 0x154   :  { %v1189_v52 = vpop.f32.mrf.mxu2 }
 0x155   :  { %v1238_v10 = vpop.f32.mrf.mxu3  ;;  %v1190_v2 = vadd.f32 %v1189_v52, %v3164_v13 }
 0x156   :  { %v1289_v7 = vpop.f32.mrf.mxu0 }
 0x157   :  { %v1239_v6 = vadd.f32 %v1238_v10, %v1190_v2 }
 0x158   :  { %v1338_v8 = vpop.f32.mrf.mxu1 }
 0x159   :  { %v1288_v11 = vadd.f32 %v1287_v63, %v1239_v6 }
 0x15b   :  { %v3381_v12 = vadd.f32 %v1336_v0, %v1288_v11 }
 0x15c   :  { %v1191_v14 = vpop.f32.mrf.mxu2 }
 0x15d   :  { %v1240_v15 = vpop.f32.mrf.mxu3  ;;  %v1192_v23 = vadd.f32 %v1191_v14, %v3186_v28  ;;  %v3395_v28 = vld [vmem:[%s3497_s3] ss:$0 sm:$0xff] }
 0x15e   :  { %v1448_v20 = vpop.f32.mrf.mxu0 }
 0x15f   :  { %v1241_v19 = vadd.f32 %v1240_v15, %v1192_v23 }
 0x160   :  { %v1625_v21 = vpop.f32.mrf.mxu1 }
 0x161   :  { %v1290_v22 = vadd.f32 %v1289_v7, %v1241_v19 }
 0x163   :  { %v3384_v24 = vadd.f32 %v1338_v8, %v1290_v22 }
 0x164   :  { %v1350_v25 = vpop.f32.mrf.mxu2 }
 0x165   :  { %v1399_v27 = vpop.f32.mrf.mxu3  ;;  %v1351_v13 = vadd.f32 %v1350_v25, %v3204_v47 }
 0x166   :  { %v1450_v31 = vpop.f32.mrf.mxu0 }
 0x167   :  { %v1400_v29 = vadd.f32 %v1399_v27, %v1351_v13 }
 0x168   :  { %v1627_v32 = vpop.f32.mrf.mxu1 }
 0x169   :  { %v1449_v33 = vadd.f32 %v1448_v20, %v1400_v29 }
 0x16b   :  { %v1669_v34 = vmul.f32 %v3390_v30, %v1449_v33 }
 0x16c   :  { %v1352_v26 = vpop.f32.mrf.mxu2 }
 0x16d   :  { %v1401_v16 = vpop.f32.mrf.mxu3  ;;  %v1689_v47 = vadd.f32 %v3395_v28, %v1669_v34  ;;  %v1353_v38 = vadd.f32 %v1352_v26, %v3216_v3 }
 0x16e   :  { %v1453_v41 = vpop.f32.mrf.mxu0 }
 0x16f   :  { %v1705_v39 = vadd.f32 %v1689_v47, %v1625_v21  ;;  %v1402_v40 = vadd.f32 %v1401_v16, %v1353_v38 }
 0x170   :  { %v1630_v42 = vpop.f32.mrf.mxu1 }
 0x171   :  { %v1721_v43 = vmax.f32 %v1705_v39, 0.0  ;;  %v1451_v44 = vadd.f32 %v1450_v31, %v1402_v40 }
 0x173   :  { %1737 = vst [vmem:[%s3498_s6] sm:$0xff] %v1721_v43  ;;  %v1670_v46 = vmul.f32 %v3390_v30, %v1451_v44 }
 0x174   :  { %v1355_v49 = vpop.f32.mrf.mxu2 }
 0x175   :  { %v1404_v48 = vpop.f32.mrf.mxu3  ;;  %v1690_v50 = vadd.f32 %v3395_v28, %v1670_v46  ;;  %v1356_v51 = vadd.f32 %v1355_v49, %v3231_v18 }
 0x176   :  { %v1455_v55 = vpop.f32.mrf.mxu0 }
 0x177   :  { %v1706_v54 = vadd.f32 %v1690_v50, %v1627_v32  ;;  %v1405_v3 = vadd.f32 %v1404_v48, %v1356_v51 }
 0x178   :  { %v1632_v56 = vpop.f32.mrf.mxu1 }
 0x179   :  { %v1722_v57 = vmax.f32 %v1706_v54, 0.0  ;;  %v1454_v58 = vadd.f32 %v1453_v41, %v1405_v3 }
 0x17b   :  { %1738 = vst [vmem:[%s3498_s6 + $0x8] sm:$0xff] %v1722_v57  ;;  %v1671_v60 = vmul.f32 %v3390_v30, %v1454_v58 }
 0x17c   :  { %v1357_v61 = vpop.f32.mrf.mxu2 }
 0x17d   :  { %v1406_v63 = vpop.f32.mrf.mxu3  ;;  %v1691_v0 = vadd.f32 %v3395_v28, %v1671_v60  ;;  %v1358_v1 = vadd.f32 %v1357_v61, %v3243_v35 }
 0x17e   :  { %v1458_v10 = vpop.f32.mrf.mxu0 }
 0x17f   :  { %v1707_v52 = vadd.f32 %v1691_v0, %v1630_v42  ;;  %v1407_v18 = vadd.f32 %v1406_v63, %v1358_v1 }
 0x180   :  { %v1635_v2 = vpop.f32.mrf.mxu1 }
 0x181   :  { %v1723_v6 = vmax.f32 %v1707_v52, 0.0  ;;  %v1456_v7 = vadd.f32 %v1455_v55, %v1407_v18 }
 0x183   :  { %1739 = vst [vmem:[%s3498_s6 + $0x10] sm:$0xff] %v1723_v6  ;;  %v1672_v8 = vmul.f32 %v3390_v30, %v1456_v7 }
 0x184   :  { %v1360_v11 = vpop.f32.mrf.mxu2 }
 0x185   :  { %v1409_v14 = vpop.f32.mrf.mxu3  ;;  %v1692_v15 = vadd.f32 %v3395_v28, %v1672_v8  ;;  %v1361_v23 = vadd.f32 %v1360_v11, %v3258_v53 }
 0x186   :  { %v1460_v20 = vpop.f32.mrf.mxu0 }
 0x187   :  { %v1708_v19 = vadd.f32 %v1692_v15, %v1632_v56  ;;  %v1410_v35 = vadd.f32 %v1409_v14, %v1361_v23 }
 0x188   :  { %v1637_v21 = vpop.f32.mrf.mxu1 }
 0x189   :  { %v1724_v22 = vmax.f32 %v1708_v19, 0.0  ;;  %v1459_v25 = vadd.f32 %v1458_v10, %v1410_v35 }
 0x18b   :  { %1740 = vst [vmem:[%s3498_s6 + $0x18] sm:$0xff] %v1724_v22  ;;  %v1673_v27 = vmul.f32 %v3390_v30, %v1459_v25 }
 0x18c   :  { %v1362_v13 = vpop.f32.mrf.mxu2 }
 0x18d   :  { %v1411_v29 = vpop.f32.mrf.mxu3  ;;  %v1693_v31 = vadd.f32 %v3395_v28, %v1673_v27  ;;  %v1363_v32 = vadd.f32 %v1362_v13, %v3270_v4 }
 0x18e   :  { %v1463_v34 = vpop.f32.mrf.mxu0 }
 0x18f   :  { %v1709_v33 = vadd.f32 %v1693_v31, %v1635_v2  ;;  %v1412_v53 = vadd.f32 %v1411_v29, %v1363_v32 }
 0x190   :  { %v1640_v26 = vpop.f32.mrf.mxu1 }
 0x191   :  { %v1725_v16 = vmax.f32 %v1709_v33, 0.0  ;;  %v1461_v47 = vadd.f32 %v1460_v20, %v1412_v53 }
 0x193   :  { %1741 = vst [vmem:[%s3498_s6 + $0x20] sm:$0xff] %v1725_v16  ;;  %v1674_v38 = vmul.f32 %v3390_v30, %v1461_v47 }
 0x194   :  { %v1365_v39 = vpop.f32.mrf.mxu2 }
 0x195   :  { %v1414_v40 = vpop.f32.mrf.mxu3  ;;  %v1694_v41 = vadd.f32 %v3395_v28, %v1674_v38  ;;  %v1366_v42 = vadd.f32 %v1365_v39, %v3285_v17 }
 0x196   :  { %v1465_v44 = vpop.f32.mrf.mxu0 }
 0x197   :  { %v1710_v43 = vadd.f32 %v1694_v41, %v1637_v21  ;;  %v1415_v4 = vadd.f32 %v1414_v40, %v1366_v42 }
 0x198   :  { %v1642_v46 = vpop.f32.mrf.mxu1 }
 0x199   :  { %v1726_v49 = vmax.f32 %v1710_v43, 0.0  ;;  %v1464_v48 = vadd.f32 %v1463_v34, %v1415_v4 }
 0x19b   :  { %1742 = vst [vmem:[%s3498_s6 + $0x28] sm:$0xff] %v1726_v49  ;;  %v1675_v50 = vmul.f32 %v3390_v30, %v1464_v48 }
 0x19c   :  { %v1367_v51 = vpop.f32.mrf.mxu2 }
 0x19d   :  { %v1416_v54 = vpop.f32.mrf.mxu3  ;;  %v1695_v3 = vadd.f32 %v3395_v28, %v1675_v50  ;;  %v1368_v55 = vadd.f32 %v1367_v51, %v3297_v36 }
 0x19e   :  { %v1468_v57 = vpop.f32.mrf.mxu0 }
 0x19f   :  { %v1711_v56 = vadd.f32 %v1695_v3, %v1640_v26  ;;  %v1417_v17 = vadd.f32 %v1416_v54, %v1368_v55 }
 0x1a0   :  { %v1645_v58 = vpop.f32.mrf.mxu1 }
 0x1a1   :  { %v1727_v60 = vmax.f32 %v1711_v56, 0.0  ;;  %v1466_v61 = vadd.f32 %v1465_v44, %v1417_v17 }
 0x1a3   :  { %1743 = vst [vmem:[%s3498_s6 + $0x30] sm:$0xff] %v1727_v60  ;;  %v1676_v63 = vmul.f32 %v3390_v30, %v1466_v61 }
 0x1a4   :  { %v1370_v0 = vpop.f32.mrf.mxu2 }
 0x1a5   :  { %v1419_v1 = vpop.f32.mrf.mxu3  ;;  %v1696_v52 = vadd.f32 %v3395_v28, %v1676_v63  ;;  %v1371_v18 = vadd.f32 %v1370_v0, %v3312_v45 }
 0x1a6   :  { %v1470_v2 = vpop.f32.mrf.mxu0 }
 0x1a7   :  { %v1712_v10 = vadd.f32 %v1696_v52, %v1642_v46  ;;  %v1420_v36 = vadd.f32 %v1419_v1, %v1371_v18 }
 0x1a8   :  { %v1647_v8 = vpop.f32.mrf.mxu1 }
 0x1a9   :  { %v1728_v6 = vmax.f32 %v1712_v10, 0.0  ;;  %v1469_v7 = vadd.f32 %v1468_v57, %v1420_v36 }
 0x1ab   :  { %1744 = vst [vmem:[%s3498_s6 + $0x38] sm:$0xff] %v1728_v6  ;;  %v1677_v11 = vmul.f32 %v3390_v30, %v1469_v7 }
 0x1ac   :  { %v1372_v14 = vpop.f32.mrf.mxu2 }
 0x1ad   :  { %v1421_v15 = vpop.f32.mrf.mxu3  ;;  %v1697_v23 = vadd.f32 %v3395_v28, %v1677_v11  ;;  %v1373_v19 = vadd.f32 %v1372_v14, %v3324_v5 }
 0x1ae   :  { %v1473_v20 = vpop.f32.mrf.mxu0 }
 0x1af   :  { %v1713_v35 = vadd.f32 %v1697_v23, %v1645_v58  ;;  %v1422_v45 = vadd.f32 %v1421_v15, %v1373_v19 }
 0x1b0   :  { %v1650_v27 = vpop.f32.mrf.mxu1 }
 0x1b1   :  { %v1729_v21 = vmax.f32 %v1713_v35, 0.0  ;;  %v1471_v22 = vadd.f32 %v1470_v2, %v1422_v45 }
 0x1b3   :  { %1745 = vst [vmem:[%s3498_s6 + $0x40] sm:$0xff] %v1729_v21  ;;  %v1678_v25 = vmul.f32 %v3390_v30, %v1471_v22 }
 0x1b4   :  { %v1375_v13 = vpop.f32.mrf.mxu2 }
 0x1b5   :  { %v1424_v29 = vpop.f32.mrf.mxu3  ;;  %v1698_v31 = vadd.f32 %v3395_v28, %v1678_v25  ;;  %v1376_v32 = vadd.f32 %v1375_v13, %v3339_v9 }
 0x1b6   :  { %v1475_v53 = vpop.f32.mrf.mxu0 }
 0x1b7   :  { %v1714_v33 = vadd.f32 %v1698_v31, %v1647_v8  ;;  %v1425_v5 = vadd.f32 %v1424_v29, %v1376_v32 }
 0x1b8   :  { %v1652_v41 = vpop.f32.mrf.mxu1 }
 0x1b9   :  { %v1730_v34 = vmax.f32 %v1714_v33, 0.0  ;;  %v1474_v26 = vadd.f32 %v1473_v20, %v1425_v5 }
 0x1bb   :  { %1746 = vst [vmem:[%s3498_s6 + $0x48] sm:$0xff] %v1730_v34  ;;  %v1679_v16 = vmul.f32 %v3390_v30, %v1474_v26 }
 0x1bc   :  { %v1377_v47 = vpop.f32.mrf.mxu2 }
 0x1bd   :  { %v1426_v38 = vpop.f32.mrf.mxu3  ;;  %v1699_v39 = vadd.f32 %v3395_v28, %v1679_v16  ;;  %v1378_v40 = vadd.f32 %v1377_v47, %v3351_v37 }
 0x1be   :  { %v1478_v44 = vpop.f32.mrf.mxu0 }
 0x1bf   :  { %v1715_v42 = vadd.f32 %v1699_v39, %v1650_v27  ;;  %v1427_v9 = vadd.f32 %v1426_v38, %v1378_v40 }
 0x1c0   :  { %v1655_v3 = vpop.f32.mrf.mxu1 }
 0x1c1   :  { %v1731_v43 = vmax.f32 %v1715_v42, 0.0  ;;  %v1476_v4 = vadd.f32 %v1475_v53, %v1427_v9 }
 0x1c3   :  { %1747 = vst [vmem:[%s3498_s6 + $0x50] sm:$0xff] %v1731_v43  ;;  %v1680_v46 = vmul.f32 %v3390_v30, %v1476_v4 }
 0x1c4   :  { %v1380_v49 = vpop.f32.mrf.mxu2 }
 0x1c5   :  { %v1429_v48 = vpop.f32.mrf.mxu3  ;;  %v1700_v50 = vadd.f32 %v3395_v28, %v1680_v46  ;;  %v1381_v51 = vadd.f32 %v1380_v49, %v3366_v59 }
 0x1c6   :  { %v1480_v57 = vpop.f32.mrf.mxu0 }
 0x1c7   :  { %v1716_v54 = vadd.f32 %v1700_v50, %v1652_v41  ;;  %v1430_v37 = vadd.f32 %v1429_v48, %v1381_v51 }
 0x1c8   :  { %v1657_v18 = vpop.f32.mrf.mxu1 }
 0x1c9   :  { %v1732_v55 = vmax.f32 %v1716_v54, 0.0  ;;  %v1479_v56 = vadd.f32 %v1478_v44, %v1430_v37 }
 0x1cb   :  { %1748 = vst [vmem:[%s3498_s6 + $0x58] sm:$0xff] %v1732_v55  ;;  %v1681_v17 = vmul.f32 %v3390_v30, %v1479_v56 }
 0x1cc   :  { %v1382_v58 = vpop.f32.mrf.mxu2 }
 0x1cd   :  { %v1431_v60 = vpop.f32.mrf.mxu3  ;;  %v1701_v61 = vadd.f32 %v3395_v28, %v1681_v17  ;;  %v1383_v63 = vadd.f32 %v1382_v58, %v3378_v62 }
 0x1ce   :  { %v1483_v8 = vpop.f32.mrf.mxu0 }
 0x1cf   :  { %v1717_v0 = vadd.f32 %v1701_v61, %v1655_v3  ;;  %v1432_v59 = vadd.f32 %v1431_v60, %v1383_v63 }
 0x1d0   :  { %v1660_v19 = vpop.f32.mrf.mxu1 }
 0x1d1   :  { %v1733_v1 = vmax.f32 %v1717_v0, 0.0  ;;  %v1481_v52 = vadd.f32 %v1480_v57, %v1432_v59 }
 0x1d3   :  { %1749 = vst [vmem:[%s3498_s6 + $0x60] sm:$0xff] %v1733_v1  ;;  %v1682_v10 = vmul.f32 %v3390_v30, %v1481_v52 }
 0x1d4   :  { %v1385_v36 = vpop.f32.mrf.mxu2 }
 0x1d5   :  { %v1434_v2 = vpop.f32.mrf.mxu3  ;;  %v1702_v6 = vadd.f32 %v3395_v28, %v1682_v10  ;;  %v1386_v7 = vadd.f32 %v1385_v36, %v3381_v12 }
 0x1d6   :  { %v1485_v25 = vpop.f32.mrf.mxu0 }
 0x1d7   :  { %v1718_v11 = vadd.f32 %v1702_v6, %v1657_v18  ;;  %v1435_v62 = vadd.f32 %v1434_v2, %v1386_v7 }
 0x1d8   :  { %v1662_v32 = vpop.f32.mrf.mxu1 }
 0x1d9   :  { %v1734_v14 = vmax.f32 %v1718_v11, 0.0  ;;  %v1484_v15 = vadd.f32 %v1483_v8, %v1435_v62 }
 0x1db   :  { %1750 = vst [vmem:[%s3498_s6 + $0x68] sm:$0xff] %v1734_v14  ;;  %v1683_v23 = vmul.f32 %v3390_v30, %v1484_v15 }
 0x1dc   :  { %v1387_v35 = vpop.f32.mrf.mxu2 }
 0x1dd   :  { %v1703_v45 = vadd.f32 %v3395_v28, %v1683_v23  ;;  %v1388_v20 = vadd.f32 %v1387_v35, %v3384_v24  ;;  %v1436_v21 = vpop.f32.mrf.mxu3 }
 0x1df   :  { %v1719_v22 = vadd.f32 %v1703_v45, %v1660_v19  ;;  %v1437_v12 = vadd.f32 %v1436_v21, %v1388_v20 }
 0x1e1   :  { %v1735_v27 = vmax.f32 %v1719_v22, 0.0  ;;  %v1486_v13 = vadd.f32 %v1485_v25, %v1437_v12 }
 0x1e3   :  { %1751 = vst [vmem:[%s3498_s6 + $0x70] sm:$0xff] %v1735_v27  ;;  %v1684_v29 = vmul.f32 %v3390_v30, %v1486_v13 }
 0x1e5   :  { %v1704_v31 = vadd.f32 %v3395_v28, %v1684_v29 }
 0x1e7   :  { %v1720_v33 = vadd.f32 %v1704_v31, %v1662_v32 }
 0x1e9   :  { %v1736_v5 = vmax.f32 %v1720_v33, 0.0 }
 0x1eb   :  { %1752 = vst [vmem:[%s3498_s6 + $0x78] sm:$0xff] %v1736_v5 }

// kernel: basic_block_forward.2
= control target key start
LH: loop header
LB: loop body
LE: loop exit
PB: predicated region body
PF: predicated region fallthrough
CT: control target
= control target key end

     0   :  { %s3190_s1 = inlined_call_operand.vmem [shape: bf16[1152,128], index: 1, kind: input, shape index: {}]   ;;  %s3191_s0 = inlined_call_operand.vmem [shape: bf16[128,1152], index: 0, kind: input, shape index: {}]   ;;  %s3192_s2 = inlined_call_operand.vmem [shape: f32[1,128], index: 2, kind: input, shape index: {}]   ;;  %s3193_s3 = inlined_call_operand.vmem [shape: f32[1,128], index: 3, kind: input, shape index: {}]   ;;  %s3194_s4 = inlined_call_operand.vmem [shape: bf16[128,128], index: 4, kind: output, shape index: {}]  }
   0x1   :  { %v2229_v0 = vld [vmem:[%s3190_s1 + $0x38] sm:$0xff]  ;;  %v2228_v1 = vld [vmem:[%s3190_s1 + $0x30] sm:$0xff]  ;;  %v2227_v2 = vld [vmem:[%s3190_s1 + $0x28] sm:$0xff] }
   0x2   :  { %2341 = vmatpush.bf16.msra.mxu1 %v2229_v0  ;;  %2342 = vmatpush.bf16.msra.mxu2 %v2229_v0  ;;  %v2226_v3 = vld [vmem:[%s3190_s1 + $0x20] sm:$0xff]  ;;  %v2225_v4 = vld [vmem:[%s3190_s1 + $0x18] sm:$0xff]  ;;  %v2224_v5 = vld [vmem:[%s3190_s1 + $0x10] sm:$0xff] }
   0x3   :  { %2343 = vmatpush.bf16.msra.mxu3 %v2229_v0  ;;  %1041 = vmatpush.bf16.msra.mxu0 %v2229_v0  ;;  %v2223_v6 = vld [vmem:[%s3190_s1 + $0x8] sm:$0xff]  ;;  %v2222_v7 = vld [vmem:[%s3190_s1] sm:$0xff]  ;;  %v1648_v8 = vld [vmem:[%s3191_s0 + $0x90] sm:$0xf] }
   0x4   :  { %v2172_v9 = vld [vmem:[%s3191_s0 + $0xb0] sm:$0xf0]  ;;  %v1720_v10 = vld [vmem:[%s3191_s0 + $0x120] sm:$0xf]  ;;  %v2190_v11 = vld [vmem:[%s3191_s0 + $0x140] sm:$0xf0] }
   0x5   :  { %v1792_v12 = vld [vmem:[%s3191_s0 + $0x1b0] sm:$0xf]  ;;  %v2208_v13 = vld [vmem:[%s3191_s0 + $0x1d0] sm:$0xf0]  ;;  %v1576_v14 = vld [vmem:[%s3191_s0] sm:$0xf]  ;;  %v1649_v18 = vor.u32 %v2172_v9, %v1648_v8  ;;  %v1721_v19 = vor.u32 %v2190_v11, %v1720_v10 }
   0x6   :  { %2344 = vmatpush.bf16.msra.mxu1 %v2228_v1  ;;  %2345 = vmatpush.bf16.msra.mxu2 %v2228_v1  ;;  %v2154_v15 = vld [vmem:[%s3191_s0 + $0x20] sm:$0xf0]  ;;  %v2245_v16 = vld [vmem:[%s3190_s1 + $0xb8] sm:$0xff]  ;;  %v1793_v20 = vor.u32 %v2208_v13, %v1792_v12  ;;  %v2244_v24 = vld [vmem:[%s3190_s1 + $0xb0] sm:$0xff] }
   0x7   :  { %2346 = vmatpush.bf16.msra.mxu3 %v2228_v1  ;;  %1042 = vmatpush.bf16.msra.mxu0 %v2228_v1  ;;  %v2237_v17 = vld [vmem:[%s3190_s1 + $0x78] sm:$0xff]  ;;  %v1577_v21 = vor.u32 %v2154_v15, %v1576_v14  ;;  %v2236_v25 = vld [vmem:[%s3190_s1 + $0x70] sm:$0xff]  ;;  %v2243_v28 = vld [vmem:[%s3190_s1 + $0xa8] sm:$0xff] }
   0x8   :  { %v2253_v22 = vld [vmem:[%s3190_s1 + $0xf8] sm:$0xff]  ;;  %v2252_v26 = vld [vmem:[%s3190_s1 + $0xf0] sm:$0xff]  ;;  %v2235_v29 = vld [vmem:[%s3190_s1 + $0x68] sm:$0xff] }
   0x9   :  { %v2261_v23 = vld [vmem:[%s3190_s1 + $0x138] sm:$0xff]  ;;  %v2260_v27 = vld [vmem:[%s3190_s1 + $0x130] sm:$0xff]  ;;  %v2251_v30 = vld [vmem:[%s3190_s1 + $0xe8] sm:$0xff] }
   0xa   :  { %2347 = vmatpush.bf16.msra.mxu1 %v2227_v2  ;;  %2348 = vmatpush.bf16.msra.mxu2 %v2227_v2  ;;  %v2259_v31 = vld [vmem:[%s3190_s1 + $0x128] sm:$0xff]  ;;  %v2242_v32 = vld [vmem:[%s3190_s1 + $0xa0] sm:$0xff]  ;;  %v1684_v36 = vld [vmem:[%s3191_s0 + $0xd8] sm:$0xf] }
   0xb   :  { %2349 = vmatpush.bf16.msra.mxu3 %v2227_v2  ;;  %1043 = vmatpush.bf16.msra.mxu0 %v2227_v2  ;;  %v2234_v33 = vld [vmem:[%s3190_s1 + $0x60] sm:$0xff]  ;;  %v2181_v37 = vld [vmem:[%s3191_s0 + $0xf8] sm:$0xf0]  ;;  %v1756_v38 = vld [vmem:[%s3191_s0 + $0x168] sm:$0xf] }
   0xc   :  { %v2250_v34 = vld [vmem:[%s3190_s1 + $0xe0] sm:$0xff]  ;;  %v2199_v39 = vld [vmem:[%s3191_s0 + $0x188] sm:$0xf0]  ;;  %v1828_v40 = vld [vmem:[%s3191_s0 + $0x1f8] sm:$0xf]  ;;  %v1685_v46 = vor.u32 %v2181_v37, %v1684_v36 }
   0xd   :  { %v2258_v35 = vld [vmem:[%s3190_s1 + $0x120] sm:$0xff]  ;;  %v2217_v41 = vld [vmem:[%s3191_s0 + $0x218] sm:$0xf0]  ;;  %v1612_v42 = vld [vmem:[%s3191_s0 + $0x48] sm:$0xf]  ;;  %v1757_v47 = vor.u32 %v2199_v39, %v1756_v38 }
   0xe   :  { %2350 = vmatpush.bf16.msra.mxu1 %v2226_v3  ;;  %2351 = vmatpush.bf16.msra.mxu2 %v2226_v3  ;;  %v2163_v43 = vld [vmem:[%s3191_s0 + $0x68] sm:$0xf0]  ;;  %v2241_v44 = vld [vmem:[%s3190_s1 + $0x98] sm:$0xff]  ;;  %v1829_v48 = vor.u32 %v2217_v41, %v1828_v40  ;;  %v2240_v52 = vld [vmem:[%s3190_s1 + $0x90] sm:$0xff] }
   0xf   :  { %2352 = vmatpush.bf16.msra.mxu3 %v2226_v3  ;;  %1044 = vmatpush.bf16.msra.mxu0 %v2226_v3  ;;  %v2233_v45 = vld [vmem:[%s3190_s1 + $0x58] sm:$0xff]  ;;  %v1613_v49 = vor.u32 %v2163_v43, %v1612_v42  ;;  %v2232_v53 = vld [vmem:[%s3190_s1 + $0x50] sm:$0xff]  ;;  %v2239_v56 = vld [vmem:[%s3190_s1 + $0x88] sm:$0xff] }
  0x10   :  { %v2249_v50 = vld [vmem:[%s3190_s1 + $0xd8] sm:$0xff]  ;;  %v2248_v54 = vld [vmem:[%s3190_s1 + $0xd0] sm:$0xff]  ;;  %v2231_v57 = vld [vmem:[%s3190_s1 + $0x48] sm:$0xff] }
  0x11   :  { %v2257_v51 = vld [vmem:[%s3190_s1 + $0x118] sm:$0xff]  ;;  %v2256_v55 = vld [vmem:[%s3190_s1 + $0x110] sm:$0xff]  ;;  %v2247_v58 = vld [vmem:[%s3190_s1 + $0xc8] sm:$0xff] }
  0x12   :  { %2353 = vmatpush.bf16.msra.mxu1 %v2225_v4  ;;  %2354 = vmatpush.bf16.msra.mxu2 %v2225_v4  ;;  %v2255_v59 = vld [vmem:[%s3190_s1 + $0x108] sm:$0xff]  ;;  %v2238_v60 = vld [vmem:[%s3190_s1 + $0x80] sm:$0xff]  ;;  %v2277_v2 = vld [vmem:[%s3190_s1 + $0x1b8] sm:$0xff] }
  0x13   :  { %2355 = vmatpush.bf16.msra.mxu3 %v2225_v4  ;;  %1045 = vmatpush.bf16.msra.mxu0 %v2225_v4  ;;  %v2230_v61 = vld [vmem:[%s3190_s1 + $0x40] sm:$0xff]  ;;  %v1578_v1 = vld [vmem:[%s3191_s0 + $0x24] sm:$0xf0]  ;;  %v2269_v3 = vld [vmem:[%s3190_s1 + $0x178] sm:$0xff] }
  0x14   :  { %v2150_v62 = vld [vmem:[%s3191_s0 + $0x4] sm:$0xf]  ;;  %v1584_v4 = vld [vmem:[%s3191_s0 + $0x8] sm:$0xf]  ;;  %v1592_v8 = vld [vmem:[%s3191_s0 + $0x10] sm:$0xf] }
  0x15   :  { %v2246_v63 = vld [vmem:[%s3190_s1 + $0xc0] sm:$0xff]  ;;  %v2156_v9 = vld [vmem:[%s3191_s0 + $0x30] sm:$0xf0]  ;;  %v2285_v10 = vld [vmem:[%s3190_s1 + $0x1f8] sm:$0xff]  ;;  %v1581_v12 = vor.u32 %v2150_v62, %v1578_v1 }
  0x16   :  { %2356 = vmatpush.bf16.msra.mxu1 %v2224_v5  ;;  %2357 = vmatpush.bf16.msra.mxu2 %v2224_v5  ;;  %v2254_v0 = vld [vmem:[%s3190_s1 + $0x100] sm:$0xff]  ;;  %v2293_v11 = vld [vmem:[%s3190_s1 + $0x238] sm:$0xff]  ;;  %v1593_v15 = vor.u32 %v2156_v9, %v1592_v8  ;;  %v2168_v40 = vld [vmem:[%s3191_s0 + $0x94] sm:$0xf] }
  0x17   :  { %2358 = vmatpush.bf16.msra.mxu3 %v2224_v5  ;;  %1046 = vmatpush.bf16.msra.mxu0 %v2224_v5  ;;  %v2155_v5 = vld [vmem:[%s3191_s0 + $0x28] sm:$0xf0]  ;;  %v2274_v36 = vld [vmem:[%s3190_s1 + $0x1a0] sm:$0xff]  ;;  %v1650_v41 = vld [vmem:[%s3191_s0 + $0xb4] sm:$0xf0] }
  0x18   :  { %v1585_v13 = vor.u32 %v2155_v5, %v1584_v4  ;;  %v2282_v37 = vld [vmem:[%s3190_s1 + $0x1e0] sm:$0xff]  ;;  %v1656_v42 = vld [vmem:[%s3191_s0 + $0x98] sm:$0xf]  ;;  %v2173_v43 = vld [vmem:[%s3191_s0 + $0xb8] sm:$0xf0] }
  0x19   :  { %v2266_v38 = vld [vmem:[%s3190_s1 + $0x160] sm:$0xff]  ;;  %v1700_v62 = vld [vmem:[%s3191_s0 + $0xe8] sm:$0xf]  ;;  %v2272_v4 = vld [vmem:[%s3190_s1 + $0x190] sm:$0xff] }
  0x1a   :  { %2359 = vmatpush.bf16.msra.mxu1 %v2223_v6  ;;  %2360 = vmatpush.bf16.msra.mxu2 %v2223_v6  ;;  %v2290_v39 = vld [vmem:[%s3190_s1 + $0x220] sm:$0xff]  ;;  %v2280_v5 = vld [vmem:[%s3190_s1 + $0x1d0] sm:$0xff]  ;;  %v1722_v9 = vld [vmem:[%s3191_s0 + $0x144] sm:$0xf0] }
  0x1b   :  { %2361 = vmatpush.bf16.msra.mxu3 %v2223_v6  ;;  %1047 = vmatpush.bf16.msra.mxu0 %v2223_v6  ;;  %v2151_v6 = vld [vmem:[%s3191_s0 + $0xc] sm:$0xf]  ;;  %v2186_v8 = vld [vmem:[%s3191_s0 + $0x124] sm:$0xf] }
  0x1e   :  { %2362 = vmatpush.bf16.msra.mxu1 %v2222_v7  ;;  %2363 = vmatpush.bf16.msra.mxu2 %v2222_v7 }
  0x1f   :  { %2364 = vmatpush.bf16.msra.mxu3 %v2222_v7  ;;  %1048 = vmatpush.bf16.msra.mxu0 %v2222_v7  ;;  %v1586_v7 = vld [vmem:[%s3191_s0 + $0x2c] sm:$0xf0] }
  0x20   :  { %v1589_v14 = vor.u32 %v2151_v6, %v1586_v7  ;;  %v2264_v6 = vld [vmem:[%s3190_s1 + $0x150] sm:$0xff] }
  0x21   :  { %1059 = vmatmul.bf16.vlgmr.msra.gmra.mxu1 %v1649_v18  ;;  %1069 = vmatmul.bf16.vlgmr.msra.gmra.mxu2 %v1721_v19  ;;  %v2284_v18 = vld [vmem:[%s3190_s1 + $0x1f0] sm:$0xff] }
  0x22   :  { %1139 = vmatpush.bf16.msrb.mxu2 %v2245_v16  ;;  %1090 = vmatpush.bf16.msrb.mxu1 %v2237_v17  ;;  %v2276_v16 = vld [vmem:[%s3190_s1 + $0x1b0] sm:$0xff] }
  0x23   :  { %1079 = vmatmul.bf16.vlgmr.msra.gmra.mxu3 %v1793_v20  ;;  %1049 = vmatmul.bf16.vlgmr.msra.gmra.mxu0 %v1577_v21  ;;  %v2268_v17 = vld [vmem:[%s3190_s1 + $0x170] sm:$0xff]  ;;  %v2275_v20 = vld [vmem:[%s3190_s1 + $0x1a8] sm:$0xff] }
  0x24   :  { %1188 = vmatpush.bf16.msrb.mxu3 %v2253_v22  ;;  %1237 = vmatpush.bf16.msrb.mxu0 %v2261_v23  ;;  %v2292_v19 = vld [vmem:[%s3190_s1 + $0x230] sm:$0xff]  ;;  %v2267_v21 = vld [vmem:[%s3190_s1 + $0x168] sm:$0xff] }
  0x25   :  { %v2283_v22 = vld [vmem:[%s3190_s1 + $0x1e8] sm:$0xff]  ;;  %v2288_v7 = vld [vmem:[%s3190_s1 + $0x210] sm:$0xff] }
  0x26   :  { %1140 = vmatpush.bf16.msrb.mxu2 %v2244_v24  ;;  %1091 = vmatpush.bf16.msrb.mxu1 %v2236_v25  ;;  %v2291_v23 = vld [vmem:[%s3190_s1 + $0x228] sm:$0xff]  ;;  %v1614_v25 = vld [vmem:[%s3191_s0 + $0x6c] sm:$0xf0] }
  0x27   :  { %v2159_v24 = vld [vmem:[%s3191_s0 + $0x4c] sm:$0xf] }
  0x28   :  { %1189 = vmatpush.bf16.msrb.mxu3 %v2252_v26  ;;  %1238 = vmatpush.bf16.msrb.mxu0 %v2260_v27  ;;  %v1620_v26 = vld [vmem:[%s3191_s0 + $0x50] sm:$0xf]  ;;  %v2164_v27 = vld [vmem:[%s3191_s0 + $0x70] sm:$0xf0] }
  0x2a   :  { %1141 = vmatpush.bf16.msrb.mxu2 %v2243_v28  ;;  %1092 = vmatpush.bf16.msrb.mxu1 %v2235_v29  ;;  %v2160_v28 = vld [vmem:[%s3191_s0 + $0x54] sm:$0xf]  ;;  %v1622_v29 = vld [vmem:[%s3191_s0 + $0x74] sm:$0xf0] }
  0x2c   :  { %1190 = vmatpush.bf16.msrb.mxu3 %v2251_v30  ;;  %1239 = vmatpush.bf16.msrb.mxu0 %v2259_v31  ;;  %v1628_v30 = vld [vmem:[%s3191_s0 + $0x58] sm:$0xf]  ;;  %v2165_v31 = vld [vmem:[%s3191_s0 + $0x78] sm:$0xf0] }
  0x2e   :  { %1142 = vmatpush.bf16.msrb.mxu2 %v2242_v32  ;;  %1093 = vmatpush.bf16.msrb.mxu1 %v2234_v33  ;;  %v1617_v32 = vor.u32 %v2159_v24, %v1614_v25  ;;  %v1621_v33 = vor.u32 %v2164_v27, %v1620_v26  ;;  %v2195_v24 = vld [vmem:[%s3191_s0 + $0x16c] sm:$0xf]  ;;  %v1758_v25 = vld [vmem:[%s3191_s0 + $0x18c] sm:$0xf0]  ;;  %v2200_v27 = vld [vmem:[%s3191_s0 + $0x190] sm:$0xf0] }
  0x2f   :  { %v1764_v26 = vld [vmem:[%s3191_s0 + $0x170] sm:$0xf] }
  0x30   :  { %1191 = vmatpush.bf16.msrb.mxu3 %v2250_v34  ;;  %1240 = vmatpush.bf16.msrb.mxu0 %v2258_v35  ;;  %v1625_v34 = vor.u32 %v2160_v28, %v1622_v29  ;;  %v1629_v35 = vor.u32 %v2165_v31, %v1628_v30  ;;  %v2196_v28 = vld [vmem:[%s3191_s0 + $0x174] sm:$0xf]  ;;  %v1766_v29 = vld [vmem:[%s3191_s0 + $0x194] sm:$0xf0]  ;;  %v2201_v31 = vld [vmem:[%s3191_s0 + $0x198] sm:$0xf0] }
  0x31   :  { %1064 = vmatmul.bf16.gmra.mxu1 %v1685_v46  ;;  %1074 = vmatmul.bf16.gmra.mxu2 %v1757_v47  ;;  %v1664_v46 = vld [vmem:[%s3191_s0 + $0xa0] sm:$0xf]  ;;  %v2174_v47 = vld [vmem:[%s3191_s0 + $0xc0] sm:$0xf0]  ;;  %v1772_v30 = vld [vmem:[%s3191_s0 + $0x178] sm:$0xf] }
  0x32   :  { %1143 = vmatpush.bf16.msrb.mxu2 %v2241_v44  ;;  %1094 = vmatpush.bf16.msrb.mxu1 %v2233_v45  ;;  %v2169_v44 = vld [vmem:[%s3191_s0 + $0x9c] sm:$0xf]  ;;  %v1658_v45 = vld [vmem:[%s3191_s0 + $0xbc] sm:$0xf0] }
  0x33   :  { %1084 = vmatmul.bf16.gmra.mxu3 %v1829_v48  ;;  %1054 = vmatmul.bf16.gmra.mxu0 %v1613_v49  ;;  %v1653_v48 = vor.u32 %v2168_v40, %v1650_v41  ;;  %v1657_v49 = vor.u32 %v2173_v43, %v1656_v42  ;;  %v2204_v40 = vld [vmem:[%s3191_s0 + $0x1b4] sm:$0xf]  ;;  %v1794_v41 = vld [vmem:[%s3191_s0 + $0x1d4] sm:$0xf0]  ;;  %v2209_v43 = vld [vmem:[%s3191_s0 + $0x1d8] sm:$0xf0] }
  0x34   :  { %1192 = vmatpush.bf16.msrb.mxu3 %v2249_v50  ;;  %1241 = vmatpush.bf16.msrb.mxu0 %v2257_v51  ;;  %v1661_v50 = vor.u32 %v2169_v44, %v1658_v45  ;;  %v1665_v51 = vor.u32 %v2174_v47, %v1664_v46  ;;  %v1800_v42 = vld [vmem:[%s3191_s0 + $0x1b8] sm:$0xf]  ;;  %v2205_v44 = vld [vmem:[%s3191_s0 + $0x1bc] sm:$0xf]  ;;  %v1802_v45 = vld [vmem:[%s3191_s0 + $0x1dc] sm:$0xf0] }
  0x35   :  { %v1808_v46 = vld [vmem:[%s3191_s0 + $0x1c0] sm:$0xf]  ;;  %v2210_v47 = vld [vmem:[%s3191_s0 + $0x1e0] sm:$0xf0] }
  0x36   :  { %1144 = vmatpush.bf16.msrb.mxu2 %v2240_v52  ;;  %1095 = vmatpush.bf16.msrb.mxu1 %v2232_v53  ;;  %v2273_v52 = vld [vmem:[%s3190_s1 + $0x198] sm:$0xff] }
  0x37   :  { %v2281_v53 = vld [vmem:[%s3190_s1 + $0x1d8] sm:$0xff] }
  0x38   :  { %1193 = vmatpush.bf16.msrb.mxu3 %v2248_v54  ;;  %1242 = vmatpush.bf16.msrb.mxu0 %v2256_v55  ;;  %v2265_v54 = vld [vmem:[%s3190_s1 + $0x158] sm:$0xff] }
  0x39   :  { %v2289_v55 = vld [vmem:[%s3190_s1 + $0x218] sm:$0xff] }
  0x3a   :  { %1145 = vmatpush.bf16.msrb.mxu2 %v2239_v56  ;;  %1096 = vmatpush.bf16.msrb.mxu1 %v2231_v57  ;;  %v2177_v56 = vld [vmem:[%s3191_s0 + $0xdc] sm:$0xf]  ;;  %v1686_v57 = vld [vmem:[%s3191_s0 + $0xfc] sm:$0xf0] }
  0x3c   :  { %1194 = vmatpush.bf16.msrb.mxu3 %v2247_v58  ;;  %1243 = vmatpush.bf16.msrb.mxu0 %v2255_v59  ;;  %v1692_v58 = vld [vmem:[%s3191_s0 + $0xe0] sm:$0xf]  ;;  %v2182_v59 = vld [vmem:[%s3191_s0 + $0x100] sm:$0xf0] }
  0x3d   :  { %v1693_v1 = vor.u32 %v2182_v59, %v1692_v58  ;;  %v2213_v58 = vld [vmem:[%s3191_s0 + $0x1fc] sm:$0xf]  ;;  %v1830_v59 = vld [vmem:[%s3191_s0 + $0x21c] sm:$0xf0] }
  0x3e   :  { %1146 = vmatpush.bf16.msrb.mxu2 %v2238_v60  ;;  %1097 = vmatpush.bf16.msrb.mxu1 %v2230_v61  ;;  %v2178_v60 = vld [vmem:[%s3191_s0 + $0xe4] sm:$0xf]  ;;  %v1694_v61 = vld [vmem:[%s3191_s0 + $0x104] sm:$0xf0] }
  0x40   :  { %1195 = vmatpush.bf16.msrb.mxu3 %v2246_v63  ;;  %1244 = vmatpush.bf16.msrb.mxu0 %v2254_v0  ;;  %v2183_v63 = vld [vmem:[%s3191_s0 + $0x108] sm:$0xf0]  ;;  %v1689_v0 = vor.u32 %v2177_v56, %v1686_v57 }
  0x41   :  { %1098 = vmatmul.bf16.vlgmr.msrb.gmra.mxu1 %v1581_v12  ;;  %1147 = vmatmul.bf16.vlgmr.msrb.gmra.mxu2 %v1585_v13  ;;  %v2187_v12 = vld [vmem:[%s3191_s0 + $0x12c] sm:$0xf]  ;;  %v1730_v13 = vld [vmem:[%s3191_s0 + $0x14c] sm:$0xf0] }
  0x42   :  { %1335 = vmatpush.bf16.msra.mxu2 %v2277_v2  ;;  %1286 = vmatpush.bf16.msra.mxu1 %v2269_v3  ;;  %v1697_v2 = vor.u32 %v2178_v60, %v1694_v61  ;;  %v1701_v3 = vor.u32 %v2183_v63, %v1700_v62  ;;  %v1836_v60 = vld [vmem:[%s3191_s0 + $0x200] sm:$0xf]  ;;  %v2218_v61 = vld [vmem:[%s3191_s0 + $0x220] sm:$0xf0]  ;;  %v1838_v63 = vld [vmem:[%s3191_s0 + $0x224] sm:$0xf0] }
  0x43   :  { %1196 = vmatmul.bf16.vlgmr.msrb.gmra.mxu3 %v1589_v14  ;;  %1245 = vmatmul.bf16.vlgmr.msrb.gmra.mxu0 %v1593_v15  ;;  %v1736_v14 = vld [vmem:[%s3191_s0 + $0x130] sm:$0xf]  ;;  %v2192_v15 = vld [vmem:[%s3191_s0 + $0x150] sm:$0xf0]  ;;  %v2214_v62 = vld [vmem:[%s3191_s0 + $0x204] sm:$0xf] }
  0x44   :  { %1384 = vmatpush.bf16.msra.mxu3 %v2285_v10  ;;  %1433 = vmatpush.bf16.msra.mxu0 %v2293_v11  ;;  %v1728_v10 = vld [vmem:[%s3191_s0 + $0x128] sm:$0xf]  ;;  %v2191_v11 = vld [vmem:[%s3191_s0 + $0x148] sm:$0xf0] }
  0x46   :  { %1336 = vmatpush.bf16.msra.mxu2 %v2276_v16  ;;  %1287 = vmatpush.bf16.msra.mxu1 %v2268_v17  ;;  %v1725_v16 = vor.u32 %v2186_v8, %v1722_v9  ;;  %v1729_v17 = vor.u32 %v2191_v11, %v1728_v10 }
  0x48   :  { %1385 = vmatpush.bf16.msra.mxu3 %v2284_v18  ;;  %1434 = vmatpush.bf16.msra.mxu0 %v2292_v19  ;;  %v1733_v18 = vor.u32 %v2187_v12, %v1730_v13  ;;  %v1737_v19 = vor.u32 %v2192_v15, %v1736_v14  ;;  %v2152_v14 = vld [vmem:[%s3191_s0 + $0x14] sm:$0xf]  ;;  %v1594_v15 = vld [vmem:[%s3191_s0 + $0x34] sm:$0xf0] }
  0x4a   :  { %1337 = vmatpush.bf16.msra.mxu2 %v2275_v20  ;;  %1288 = vmatpush.bf16.msra.mxu1 %v2267_v21  ;;  %v2271_v20 = vld [vmem:[%s3190_s1 + $0x188] sm:$0xff] }
  0x4b   :  { %v2279_v21 = vld [vmem:[%s3190_s1 + $0x1c8] sm:$0xff] }
  0x4c   :  { %1386 = vmatpush.bf16.msra.mxu3 %v2283_v22  ;;  %1435 = vmatpush.bf16.msra.mxu0 %v2291_v23  ;;  %v2263_v22 = vld [vmem:[%s3190_s1 + $0x148] sm:$0xff] }
  0x4d   :  { %v2287_v23 = vld [vmem:[%s3190_s1 + $0x208] sm:$0xff] }
  0x4e   :  { %1338 = vmatpush.bf16.msra.mxu2 %v2274_v36  ;;  %1289 = vmatpush.bf16.msra.mxu1 %v2266_v38  ;;  %v2270_v36 = vld [vmem:[%s3190_s1 + $0x180] sm:$0xff] }
  0x4f   :  { %v2262_v38 = vld [vmem:[%s3190_s1 + $0x140] sm:$0xff] }
  0x50   :  { %1387 = vmatpush.bf16.msra.mxu3 %v2282_v37  ;;  %1436 = vmatpush.bf16.msra.mxu0 %v2290_v39  ;;  %v2278_v37 = vld [vmem:[%s3190_s1 + $0x1c0] sm:$0xff] }
  0x51   :  { %1103 = vmatmul.bf16.gmra.mxu1 %v1617_v32  ;;  %1152 = vmatmul.bf16.gmra.mxu2 %v1621_v33  ;;  %v1761_v32 = vor.u32 %v2195_v24, %v1758_v25  ;;  %v1765_v33 = vor.u32 %v2200_v27, %v1764_v26  ;;  %v2286_v39 = vld [vmem:[%s3190_s1 + $0x200] sm:$0xff]  ;;  %v1597_v24 = vor.u32 %v2152_v14, %v1594_v15 }
  0x52   :  { %1339 = vmatpush.bf16.msra.mxu2 %v2273_v52  ;;  %1290 = vmatpush.bf16.msra.mxu1 %v2265_v54  ;;  %v1809_v52 = vor.u32 %v2210_v47, %v1808_v46  ;;  %v2167_v46 = vld [vmem:[%s3191_s0 + $0x88] sm:$0xf0]  ;;  %v2170_v14 = vld [vmem:[%s3191_s0 + $0xa4] sm:$0xf] }
  0x53   :  { %1201 = vmatmul.bf16.gmra.mxu3 %v1625_v34  ;;  %1250 = vmatmul.bf16.gmra.mxu0 %v1629_v35  ;;  %v1769_v34 = vor.u32 %v2196_v28, %v1766_v29  ;;  %v1773_v35 = vor.u32 %v2201_v31, %v1772_v30 }
  0x54   :  { %1388 = vmatpush.bf16.msra.mxu3 %v2281_v53  ;;  %1437 = vmatpush.bf16.msra.mxu0 %v2289_v55 }
  0x56   :  { %1340 = vmatpush.bf16.msra.mxu2 %v2272_v4  ;;  %1291 = vmatpush.bf16.msra.mxu1 %v2264_v6  ;;  %v1833_v4 = vor.u32 %v2213_v58, %v1830_v59 }
  0x58   :  { %1389 = vmatpush.bf16.msra.mxu3 %v2280_v5  ;;  %1438 = vmatpush.bf16.msra.mxu0 %v2288_v7  ;;  %v1837_v5 = vor.u32 %v2218_v61, %v1836_v60  ;;  %v1841_v7 = vor.u32 %v2214_v62, %v1838_v63 }
  0x5a   :  { %1341 = vmatpush.bf16.msra.mxu2 %v2271_v20  ;;  %1292 = vmatpush.bf16.msra.mxu1 %v2263_v22  ;;  %v1608_v20 = vld [vmem:[%s3191_s0 + $0x20] sm:$0xf] }
  0x5c   :  { %1390 = vmatpush.bf16.msra.mxu3 %v2279_v21  ;;  %1439 = vmatpush.bf16.msra.mxu0 %v2287_v23  ;;  %v2158_v21 = vld [vmem:[%s3191_s0 + $0x40] sm:$0xf0] }
  0x5d   :  { %v1609_v28 = vor.u32 %v2158_v21, %v1608_v20  ;;  %v2176_v20 = vld [vmem:[%s3191_s0 + $0xd0] sm:$0xf0] }
  0x5e   :  { %1342 = vmatpush.bf16.msra.mxu2 %v2270_v36  ;;  %1293 = vmatpush.bf16.msra.mxu1 %v2262_v38  ;;  %v2161_v38 = vld [vmem:[%s3191_s0 + $0x5c] sm:$0xf] }
  0x60   :  { %1391 = vmatpush.bf16.msra.mxu3 %v2278_v37  ;;  %1440 = vmatpush.bf16.msra.mxu0 %v2286_v39  ;;  %v1630_v39 = vld [vmem:[%s3191_s0 + $0x7c] sm:$0xf0] }
  0x61   :  { %1108 = vmatmul.bf16.gmra.mxu1 %v1653_v48  ;;  %1157 = vmatmul.bf16.gmra.mxu2 %v1657_v49  ;;  %v1797_v48 = vor.u32 %v2204_v40, %v1794_v41  ;;  %v1801_v49 = vor.u32 %v2209_v43, %v1800_v42  ;;  %v1636_v41 = vld [vmem:[%s3191_s0 + $0x60] sm:$0xf]  ;;  %v2166_v42 = vld [vmem:[%s3191_s0 + $0x80] sm:$0xf0] }
  0x62   :  { %v2162_v43 = vld [vmem:[%s3191_s0 + $0x64] sm:$0xf] }
  0x63   :  { %1206 = vmatmul.bf16.gmra.mxu3 %v1661_v50  ;;  %1255 = vmatmul.bf16.gmra.mxu0 %v1665_v51  ;;  %v1805_v51 = vor.u32 %v2205_v44, %v1802_v45  ;;  %v1638_v44 = vld [vmem:[%s3191_s0 + $0x84] sm:$0xf0] }
  0x64   :  { %v1644_v45 = vld [vmem:[%s3191_s0 + $0x68] sm:$0xf] }
  0x65   :  { %v1645_v58 = vor.u32 %v2167_v46, %v1644_v45  ;;  %v1708_v45 = vld [vmem:[%s3191_s0 + $0xf0] sm:$0xf]  ;;  %v2184_v46 = vld [vmem:[%s3191_s0 + $0x110] sm:$0xf0] }
  0x71   :  { %1113 = vmatmul.bf16.gmra.mxu1 %v1689_v0  ;;  %1162 = vmatmul.bf16.gmra.mxu2 %v1693_v1  ;;  %v1844_v0 = vld [vmem:[%s3191_s0 + $0x208] sm:$0xf]  ;;  %v2219_v1 = vld [vmem:[%s3191_s0 + $0x228] sm:$0xf0] }
  0x72   :  { %v1845_v8 = vor.u32 %v2219_v1, %v1844_v0 }
  0x73   :  { %1211 = vmatmul.bf16.gmra.mxu3 %v1697_v2  ;;  %1260 = vmatmul.bf16.gmra.mxu0 %v1701_v3 }
  0x81   :  { %1118 = vmatmul.bf16.gmra.mxu1 %v1725_v16  ;;  %1167 = vmatmul.bf16.gmra.mxu2 %v1729_v17  ;;  %v1600_v16 = vld [vmem:[%s3191_s0 + $0x18] sm:$0xf]  ;;  %v2157_v17 = vld [vmem:[%s3191_s0 + $0x38] sm:$0xf0] }
  0x82   :  { %v1601_v25 = vor.u32 %v2157_v17, %v1600_v16  ;;  %v1672_v16 = vld [vmem:[%s3191_s0 + $0xa8] sm:$0xf]  ;;  %v2175_v17 = vld [vmem:[%s3191_s0 + $0xc8] sm:$0xf0] }
  0x83   :  { %1216 = vmatmul.bf16.gmra.mxu3 %v1733_v18  ;;  %1265 = vmatmul.bf16.gmra.mxu0 %v1737_v19  ;;  %v2153_v18 = vld [vmem:[%s3191_s0 + $0x1c] sm:$0xf]  ;;  %v1602_v19 = vld [vmem:[%s3191_s0 + $0x3c] sm:$0xf0] }
  0x84   :  { %v1605_v27 = vor.u32 %v2153_v18, %v1602_v19  ;;  %v1674_v18 = vld [vmem:[%s3191_s0 + $0xcc] sm:$0xf0] }
  0x85   :  { %v1680_v19 = vld [vmem:[%s3191_s0 + $0xb0] sm:$0xf] }
  0x91   :  { %1123 = vmatmul.bf16.gmra.mxu1 %v1761_v32  ;;  %1172 = vmatmul.bf16.gmra.mxu2 %v1765_v33 }
  0x93   :  { %1221 = vmatmul.bf16.gmra.mxu3 %v1769_v34  ;;  %1270 = vmatmul.bf16.gmra.mxu0 %v1773_v35 }
  0x9e   :  { %v2824_v50 = vpop.f32.mrf.mxu1 }
  0xa0   :  { %v1050_v53 = vpop.f32.mrf.mxu0 }
  0xa1   :  { %1128 = vmatmul.bf16.gmra.mxu1 %v1797_v48  ;;  %1177 = vmatmul.bf16.gmra.mxu2 %v1801_v49 }
  0xa3   :  { %1226 = vmatmul.bf16.gmra.mxu3 %v1805_v51  ;;  %1275 = vmatmul.bf16.gmra.mxu0 %v1809_v52  ;;  %v1633_v51 = vor.u32 %v2161_v38, %v1630_v39  ;;  %v1637_v52 = vor.u32 %v2166_v42, %v1636_v41 }
  0xa4   :  { %v2826_v54 = vpop.f32.mrf.mxu2 }
  0xa6   :  { %v2828_v55 = vpop.f32.mrf.mxu3  ;;  %v2830_v56 = vpop.f32.mrf.mxu1 }
  0xa8   :  { %v1052_v57 = vpop.f32.mrf.mxu0 }
  0xac   :  { %v2856_v2 = vpop.f32.mrf.mxu2 }
  0xae   :  { %v2858_v3 = vpop.f32.mrf.mxu3  ;;  %v2860_v6 = vpop.f32.mrf.mxu1 }
  0xb0   :  { %v1055_v9 = vpop.f32.mrf.mxu0 }
  0xb1   :  { %1133 = vmatmul.bf16.gmra.mxu1 %v1833_v4  ;;  %1182 = vmatmul.bf16.gmra.mxu2 %v1837_v5 }
  0xb3   :  { %1231 = vmatmul.bf16.gmra.mxu3 %v1841_v7  ;;  %1280 = vmatmul.bf16.gmra.mxu0 %v1845_v8 }
  0xb4   :  { %v2862_v10 = vpop.f32.mrf.mxu2 }
  0xb6   :  { %v2864_v11 = vpop.f32.mrf.mxu3  ;;  %v2866_v12 = vpop.f32.mrf.mxu1 }
  0xb8   :  { %v1057_v13 = vpop.f32.mrf.mxu0 }
  0xbc   :  { %v2892_v22 = vpop.f32.mrf.mxu2 }
  0xbe   :  { %v2894_v23 = vpop.f32.mrf.mxu3  ;;  %v1099_v26 = vpop.f32.mrf.mxu1 }
  0xbf   :  { %v1100_v29 = vadd.f32 %v1099_v26, %v1050_v53 }
  0xc0   :  { %v1246_v30 = vpop.f32.mrf.mxu0 }
  0xc1   :  { %1294 = vmatmul.bf16.vlgmr.msra.gmra.mxu1 %v1597_v24  ;;  %1343 = vmatmul.bf16.vlgmr.msra.gmra.mxu2 %v1601_v25 }
  0xc3   :  { %1392 = vmatmul.bf16.vlgmr.msra.gmra.mxu3 %v1605_v27  ;;  %1441 = vmatmul.bf16.vlgmr.msra.gmra.mxu0 %v1609_v28  ;;  %v1673_v27 = vor.u32 %v2175_v17, %v1672_v16 }
  0xc4   :  { %v1148_v31 = vpop.f32.mrf.mxu2 }
  0xc5   :  { %v1149_v32 = vadd.f32 %v1148_v31, %v1100_v29 }
  0xc6   :  { %v1197_v33 = vpop.f32.mrf.mxu3  ;;  %v1101_v34 = vpop.f32.mrf.mxu1 }
  0xc7   :  { %v1198_v35 = vadd.f32 %v1197_v33, %v1149_v32  ;;  %v1102_v36 = vadd.f32 %v1101_v34, %v1052_v57  ;;  %v1641_v57 = vor.u32 %v2162_v43, %v1638_v44  ;;  %v2179_v43 = vld [vmem:[%s3191_s0 + $0xec] sm:$0xf] }
  0xc8   :  { %v1248_v37 = vpop.f32.mrf.mxu0 }
  0xc9   :  { %v2902_v40 = vadd.f32 %v1246_v30, %v1198_v35  ;;  %v1681_v30 = vor.u32 %v2176_v20, %v1680_v19  ;;  %v1744_v19 = vld [vmem:[%s3191_s0 + $0x138] sm:$0xf]  ;;  %v2193_v20 = vld [vmem:[%s3191_s0 + $0x158] sm:$0xf0] }
  0xcc   :  { %v1150_v47 = vpop.f32.mrf.mxu2 }
  0xcd   :  { %v1151_v48 = vadd.f32 %v1150_v47, %v1102_v36  ;;  %v1710_v47 = vld [vmem:[%s3191_s0 + $0x114] sm:$0xf0] }
  0xce   :  { %v1199_v49 = vpop.f32.mrf.mxu3  ;;  %v1104_v53 = vpop.f32.mrf.mxu1 }
  0xcf   :  { %v1200_v59 = vadd.f32 %v1199_v49, %v1151_v48  ;;  %v1105_v60 = vadd.f32 %v1104_v53, %v1055_v9  ;;  %v1666_v9 = vld [vmem:[%s3191_s0 + $0xc4] sm:$0xf0]  ;;  %v1716_v48 = vld [vmem:[%s3191_s0 + $0xf8] sm:$0xf]  ;;  %v2185_v49 = vld [vmem:[%s3191_s0 + $0x118] sm:$0xf0] }
  0xd0   :  { %v1251_v61 = vpop.f32.mrf.mxu0  ;;  %v1669_v26 = vor.u32 %v2170_v14, %v1666_v9 }
  0xd1   :  { %1299 = vmatmul.bf16.gmra.mxu1 %v1633_v51  ;;  %1348 = vmatmul.bf16.gmra.mxu2 %v1637_v52  ;;  %v2922_v62 = vadd.f32 %v1248_v37, %v1200_v59 }
  0xd3   :  { %1397 = vmatmul.bf16.gmra.mxu3 %v1641_v57  ;;  %1446 = vmatmul.bf16.gmra.mxu0 %v1645_v58  ;;  %v1709_v58 = vor.u32 %v2184_v46, %v1708_v45  ;;  %v2197_v46 = vld [vmem:[%s3191_s0 + $0x17c] sm:$0xf] }
  0xd4   :  { %v1153_v63 = vpop.f32.mrf.mxu2 }
  0xd5   :  { %v1154_v0 = vadd.f32 %v1153_v63, %v1105_v60 }
  0xd6   :  { %v1202_v1 = vpop.f32.mrf.mxu3  ;;  %v1106_v4 = vpop.f32.mrf.mxu1 }
  0xd7   :  { %v1203_v5 = vadd.f32 %v1202_v1, %v1154_v0  ;;  %v1107_v7 = vadd.f32 %v1106_v4, %v1057_v13  ;;  %v2171_v13 = vld [vmem:[%s3191_s0 + $0xac] sm:$0xf] }
  0xd8   :  { %v1253_v8 = vpop.f32.mrf.mxu0  ;;  %v1677_v29 = vor.u32 %v2171_v13, %v1674_v18  ;;  %v2188_v13 = vld [vmem:[%s3191_s0 + $0x134] sm:$0xf] }
  0xd9   :  { %v2930_v15 = vadd.f32 %v1251_v61, %v1203_v5  ;;  %v1717_v61 = vor.u32 %v2185_v49, %v1716_v48  ;;  %v2202_v48 = vld [vmem:[%s3191_s0 + $0x1a0] sm:$0xf0] }
  0xda   :  { %v2198_v49 = vld [vmem:[%s3191_s0 + $0x184] sm:$0xf] }
  0xdc   :  { %v1155_v21 = vpop.f32.mrf.mxu2 }
  0xdd   :  { %v1156_v24 = vadd.f32 %v1155_v21, %v1107_v7  ;;  %v1746_v21 = vld [vmem:[%s3191_s0 + $0x15c] sm:$0xf0] }
  0xde   :  { %v1204_v25 = vpop.f32.mrf.mxu3  ;;  %v1109_v28 = vpop.f32.mrf.mxu1 }
  0xdf   :  { %v1205_v31 = vadd.f32 %v1204_v25, %v1156_v24  ;;  %v1110_v32 = vadd.f32 %v1109_v28, %v2824_v50  ;;  %v1702_v50 = vld [vmem:[%s3191_s0 + $0x10c] sm:$0xf0]  ;;  %v1752_v24 = vld [vmem:[%s3191_s0 + $0x140] sm:$0xf]  ;;  %v2194_v25 = vld [vmem:[%s3191_s0 + $0x160] sm:$0xf0] }
  0xe0   :  { %v1256_v33 = vpop.f32.mrf.mxu0  ;;  %v1705_v57 = vor.u32 %v2179_v43, %v1702_v50 }
  0xe1   :  { %1304 = vmatmul.bf16.gmra.mxu1 %v1669_v26  ;;  %1353 = vmatmul.bf16.gmra.mxu2 %v1673_v27  ;;  %v2951_v34 = vadd.f32 %v1253_v8, %v1205_v31 }
  0xe3   :  { %1402 = vmatmul.bf16.gmra.mxu3 %v1677_v29  ;;  %1451 = vmatmul.bf16.gmra.mxu0 %v1681_v30  ;;  %v1745_v30 = vor.u32 %v2193_v20, %v1744_v19  ;;  %v2206_v20 = vld [vmem:[%s3191_s0 + $0x1c4] sm:$0xf] }
  0xe4   :  { %v1158_v35 = vpop.f32.mrf.mxu2 }
  0xe5   :  { %v1159_v36 = vadd.f32 %v1158_v35, %v1110_v32 }
  0xe6   :  { %v1207_v37 = vpop.f32.mrf.mxu3  ;;  %v1111_v38 = vpop.f32.mrf.mxu1 }
  0xe7   :  { %v1208_v39 = vadd.f32 %v1207_v37, %v1159_v36  ;;  %v1112_v41 = vadd.f32 %v1111_v38, %v2830_v56  ;;  %v2180_v56 = vld [vmem:[%s3191_s0 + $0xf4] sm:$0xf] }
  0xe8   :  { %v1258_v42 = vpop.f32.mrf.mxu0  ;;  %v1713_v60 = vor.u32 %v2180_v56, %v1710_v47  ;;  %v1774_v56 = vld [vmem:[%s3191_s0 + $0x19c] sm:$0xf0] }
  0xe9   :  { %v2960_v44 = vadd.f32 %v1256_v33, %v1208_v39  ;;  %v1753_v33 = vor.u32 %v2194_v25, %v1752_v24  ;;  %v2211_v24 = vld [vmem:[%s3191_s0 + $0x1e8] sm:$0xf0] }
  0xea   :  { %v2207_v25 = vld [vmem:[%s3191_s0 + $0x1cc] sm:$0xf] }
  0xec   :  { %v1160_v51 = vpop.f32.mrf.mxu2 }
  0xed   :  { %v1161_v52 = vadd.f32 %v1160_v51, %v1112_v41 }
  0xee   :  { %v1209_v53 = vpop.f32.mrf.mxu3  ;;  %v1114_v59 = vpop.f32.mrf.mxu1 }
  0xef   :  { %v1210_v63 = vadd.f32 %v1209_v53, %v1161_v52  ;;  %v1115_v0 = vadd.f32 %v1114_v59, %v2860_v6  ;;  %v1738_v6 = vld [vmem:[%s3191_s0 + $0x154] sm:$0xf0]  ;;  %v1782_v52 = vld [vmem:[%s3191_s0 + $0x1a4] sm:$0xf0] }
  0xf0   :  { %v1261_v1 = vpop.f32.mrf.mxu0  ;;  %v1741_v29 = vor.u32 %v2188_v13, %v1738_v6  ;;  %v1788_v53 = vld [vmem:[%s3191_s0 + $0x188] sm:$0xf] }
  0xf1   :  { %1309 = vmatmul.bf16.gmra.mxu1 %v1705_v57  ;;  %1358 = vmatmul.bf16.gmra.mxu2 %v1709_v58  ;;  %v2981_v4 = vadd.f32 %v1258_v42, %v1210_v63  ;;  %v2203_v57 = vld [vmem:[%s3191_s0 + $0x1a8] sm:$0xf0] }
  0xf3   :  { %1407 = vmatmul.bf16.gmra.mxu3 %v1713_v60  ;;  %1456 = vmatmul.bf16.gmra.mxu0 %v1717_v61  ;;  %v1777_v61 = vor.u32 %v2197_v46, %v1774_v56 }
  0xf4   :  { %v1163_v5 = vpop.f32.mrf.mxu2 }
  0xf5   :  { %v1164_v7 = vadd.f32 %v1163_v5, %v1115_v0 }
  0xf6   :  { %v1212_v8 = vpop.f32.mrf.mxu3  ;;  %v1116_v14 = vpop.f32.mrf.mxu1 }
  0xf7   :  { %v1213_v9 = vadd.f32 %v1212_v8, %v1164_v7  ;;  %v1117_v16 = vadd.f32 %v1116_v14, %v2866_v12  ;;  %v2189_v12 = vld [vmem:[%s3191_s0 + $0x13c] sm:$0xf] }
  0xf8   :  { %v1263_v17 = vpop.f32.mrf.mxu0  ;;  %v1749_v32 = vor.u32 %v2189_v12, %v1746_v21  ;;  %v1810_v12 = vld [vmem:[%s3191_s0 + $0x1e4] sm:$0xf0] }
  0xf9   :  { %v2990_v18 = vadd.f32 %v1261_v1, %v1213_v9  ;;  %v1785_v1 = vor.u32 %v2198_v49, %v1782_v52  ;;  %v2215_v49 = vld [vmem:[%s3191_s0 + $0x20c] sm:$0xf] }
  0xfc   :  { %v1165_v26 = vpop.f32.mrf.mxu2 }
  0xfd   :  { %v1166_v27 = vadd.f32 %v1165_v26, %v1117_v16 }
  0xfe   :  { %v1214_v28 = vpop.f32.mrf.mxu3  ;;  %v1119_v31 = vpop.f32.mrf.mxu1 }
  0xff   :  { %v1215_v35 = vadd.f32 %v1214_v28, %v1166_v27  ;;  %v1120_v38 = vadd.f32 %v1119_v31, %v2826_v54  ;;  %v1780_v54 = vld [vmem:[%s3191_s0 + $0x180] sm:$0xf]  ;;  %v1818_v27 = vld [vmem:[%s3191_s0 + $0x1ec] sm:$0xf0] }
 0x100   :  { %v1266_v36 = vpop.f32.mrf.mxu0  ;;  %v1781_v63 = vor.u32 %v2202_v48, %v1780_v54  ;;  %v1824_v28 = vld [vmem:[%s3191_s0 + $0x1d0] sm:$0xf] }
 0x101   :  { %1314 = vmatmul.bf16.gmra.mxu1 %v1741_v29  ;;  %1363 = vmatmul.bf16.gmra.mxu2 %v1745_v30  ;;  %v3010_v37 = vadd.f32 %v1263_v17, %v1215_v35  ;;  %v2212_v29 = vld [vmem:[%s3191_s0 + $0x1f0] sm:$0xf0] }
 0x103   :  { %1412 = vmatmul.bf16.gmra.mxu3 %v1749_v32  ;;  %1461 = vmatmul.bf16.gmra.mxu0 %v1753_v33  ;;  %v1813_v33 = vor.u32 %v2206_v20, %v1810_v12 }
 0x104   :  { %v1168_v39 = vpop.f32.mrf.mxu2 }
 0x105   :  { %v1169_v41 = vadd.f32 %v1168_v39, %v1120_v38  ;;  %v1821_v38 = vor.u32 %v2207_v25, %v1818_v27 }
 0x106   :  { %v1217_v42 = vpop.f32.mrf.mxu3  ;;  %v1121_v43 = vpop.f32.mrf.mxu1 }
 0x107   :  { %v1218_v50 = vadd.f32 %v1217_v42, %v1169_v41  ;;  %v1122_v51 = vadd.f32 %v1121_v43, %v2856_v2  ;;  %v1789_v2 = vor.u32 %v2203_v57, %v1788_v53  ;;  %v2220_v53 = vld [vmem:[%s3191_s0 + $0x230] sm:$0xf0] }
 0x108   :  { %v1268_v45 = vpop.f32.mrf.mxu0  ;;  %v2216_v57 = vld [vmem:[%s3191_s0 + $0x214] sm:$0xf] }
 0x109   :  { %v3019_v47 = vadd.f32 %v1266_v36, %v1218_v50 }
 0x10c   :  { %v1170_v58 = vpop.f32.mrf.mxu2 }
 0x10d   :  { %v1171_v59 = vadd.f32 %v1170_v58, %v1122_v51  ;;  %v1846_v51 = vld [vmem:[%s3191_s0 + $0x22c] sm:$0xf0] }
 0x10e   :  { %v1219_v60 = vpop.f32.mrf.mxu3  ;;  %v1124_v0 = vpop.f32.mrf.mxu1 }
 0x10f   :  { %v1220_v5 = vadd.f32 %v1219_v60, %v1171_v59  ;;  %v1125_v14 = vadd.f32 %v1124_v0, %v2862_v10  ;;  %v1816_v10 = vld [vmem:[%s3191_s0 + $0x1c8] sm:$0xf]  ;;  %v1854_v59 = vld [vmem:[%s3191_s0 + $0x234] sm:$0xf0] }
 0x110   :  { %v1271_v7 = vpop.f32.mrf.mxu0  ;;  %v1817_v35 = vor.u32 %v2211_v24, %v1816_v10  ;;  %v1860_v60 = vld [vmem:[%s3191_s0 + $0x218] sm:$0xf] }
 0x111   :  { %1319 = vmatmul.bf16.gmra.mxu1 %v1777_v61  ;;  %1368 = vmatmul.bf16.gmra.mxu2 %v1781_v63  ;;  %v3040_v8 = vadd.f32 %v1268_v45, %v1220_v5  ;;  %v2221_v61 = vld [vmem:[%s3191_s0 + $0x238] sm:$0xf0] }
 0x113   :  { %1417 = vmatmul.bf16.gmra.mxu3 %v1785_v1  ;;  %1466 = vmatmul.bf16.gmra.mxu0 %v1789_v2  ;;  %v1849_v2 = vor.u32 %v2215_v49, %v1846_v51 }
 0x114   :  { %v1173_v9 = vpop.f32.mrf.mxu2 }
 0x115   :  { %v1174_v16 = vadd.f32 %v1173_v9, %v1125_v14  ;;  %v1857_v14 = vor.u32 %v2216_v57, %v1854_v59 }
 0x116   :  { %v1222_v17 = vpop.f32.mrf.mxu3  ;;  %v1126_v13 = vpop.f32.mrf.mxu1 }
 0x117   :  { %v1223_v6 = vadd.f32 %v1222_v17, %v1174_v16  ;;  %v1127_v26 = vadd.f32 %v1126_v13, %v2892_v22  ;;  %v1825_v22 = vor.u32 %v2212_v29, %v1824_v28 }
 0x118   :  { %v1273_v19 = vpop.f32.mrf.mxu0 }
 0x119   :  { %v3049_v21 = vadd.f32 %v1271_v7, %v1223_v6 }
 0x11c   :  { %v1175_v30 = vpop.f32.mrf.mxu2 }
 0x11d   :  { %v1176_v31 = vadd.f32 %v1175_v30, %v1127_v26 }
 0x11e   :  { %v1224_v32 = vpop.f32.mrf.mxu3  ;;  %v1129_v36 = vpop.f32.mrf.mxu1 }
 0x11f   :  { %v1225_v39 = vadd.f32 %v1224_v32, %v1176_v31  ;;  %v1130_v43 = vadd.f32 %v1129_v36, %v2828_v55  ;;  %v1852_v55 = vld [vmem:[%s3191_s0 + $0x210] sm:$0xf] }
 0x120   :  { %v1276_v41 = vpop.f32.mrf.mxu0  ;;  %v1853_v5 = vor.u32 %v2220_v53, %v1852_v55 }
 0x121   :  { %1324 = vmatmul.bf16.gmra.mxu1 %v1813_v33  ;;  %1373 = vmatmul.bf16.gmra.mxu2 %v1817_v35  ;;  %v3070_v42 = vadd.f32 %v1273_v19, %v1225_v39 }
 0x123   :  { %1422 = vmatmul.bf16.gmra.mxu3 %v1821_v38  ;;  %1471 = vmatmul.bf16.gmra.mxu0 %v1825_v22 }
 0x124   :  { %v1178_v50 = vpop.f32.mrf.mxu2 }
 0x125   :  { %v1179_v45 = vadd.f32 %v1178_v50, %v1130_v43 }
 0x126   :  { %v1227_v46 = vpop.f32.mrf.mxu3  ;;  %v1131_v56 = vpop.f32.mrf.mxu1 }
 0x127   :  { %v1228_v54 = vadd.f32 %v1227_v46, %v1179_v45  ;;  %v1132_v58 = vadd.f32 %v1131_v56, %v2858_v3  ;;  %v1861_v3 = vor.u32 %v2221_v61, %v1860_v60 }
 0x128   :  { %v1278_v48 = vpop.f32.mrf.mxu0 }
 0x129   :  { %v3079_v52 = vadd.f32 %v1276_v41, %v1228_v54 }
 0x12c   :  { %v1180_v63 = vpop.f32.mrf.mxu2 }
 0x12d   :  { %v1181_v0 = vadd.f32 %v1180_v63, %v1132_v58 }
 0x12e   :  { %v1229_v1 = vpop.f32.mrf.mxu3  ;;  %v1134_v7 = vpop.f32.mrf.mxu1 }
 0x12f   :  { %v1230_v9 = vadd.f32 %v1229_v1, %v1181_v0  ;;  %v1135_v13 = vadd.f32 %v1134_v7, %v2864_v11 }
 0x130   :  { %v1281_v16 = vpop.f32.mrf.mxu0 }
 0x131   :  { %1329 = vmatmul.bf16.gmra.mxu1 %v1849_v2  ;;  %1378 = vmatmul.bf16.gmra.mxu2 %v1853_v5  ;;  %v3100_v17 = vadd.f32 %v1278_v48, %v1230_v9  ;;  %v3119_v48 = vld [vmem:[%s3193_s3] ss:$0 sm:$0xff] }
 0x133   :  { %1427 = vmatmul.bf16.gmra.mxu3 %v1857_v14  ;;  %1476 = vmatmul.bf16.gmra.mxu0 %v1861_v3 }
 0x134   :  { %v1183_v6 = vpop.f32.mrf.mxu2 }
 0x135   :  { %v1184_v19 = vadd.f32 %v1183_v6, %v1135_v13 }
 0x136   :  { %v1232_v20 = vpop.f32.mrf.mxu3  ;;  %v1136_v12 = vpop.f32.mrf.mxu1 }
 0x137   :  { %v1233_v10 = vadd.f32 %v1232_v20, %v1184_v19  ;;  %v1137_v26 = vadd.f32 %v1136_v12, %v2894_v23  ;;  %v3112_v23 = vld [vmem:[%s3192_s2] ss:$0 sm:$0xff] }
 0x138   :  { %v1283_v24 = vpop.f32.mrf.mxu0 }
 0x139   :  { %v3103_v25 = vadd.f32 %v1281_v16, %v1233_v10 }
 0x13c   :  { %v1185_v27 = vpop.f32.mrf.mxu2 }
 0x13d   :  { %v1186_v28 = vadd.f32 %v1185_v27, %v1137_v26 }
 0x13e   :  { %v1234_v29 = vpop.f32.mrf.mxu3  ;;  %v1295_v30 = vpop.f32.mrf.mxu1 }
 0x13f   :  { %v1235_v31 = vadd.f32 %v1234_v29, %v1186_v28  ;;  %v1296_v11 = vadd.f32 %v1295_v30, %v2902_v40 }
 0x140   :  { %v1442_v32 = vpop.f32.mrf.mxu0 }
 0x141   :  { %v3106_v33 = vadd.f32 %v1283_v24, %v1235_v31 }
 0x144   :  { %v1344_v35 = vpop.f32.mrf.mxu2 }
 0x145   :  { %v1345_v36 = vadd.f32 %v1344_v35, %v1296_v11 }
 0x146   :  { %v1393_v38 = vpop.f32.mrf.mxu3  ;;  %v1297_v22 = vpop.f32.mrf.mxu1 }
 0x147   :  { %v1394_v39 = vadd.f32 %v1393_v38, %v1345_v36  ;;  %v1298_v50 = vadd.f32 %v1297_v22, %v2922_v62 }
 0x148   :  { %v1444_v41 = vpop.f32.mrf.mxu0 }
 0x149   :  { %v1443_v43 = vadd.f32 %v1442_v32, %v1394_v39 }
 0x14b   :  { %v1486_v40 = vmul.f32 %v3112_v23, %v1443_v43 }
 0x14c   :  { %v1346_v45 = vpop.f32.mrf.mxu2 }
 0x14d   :  { %v1347_v46 = vadd.f32 %v1346_v45, %v1298_v50  ;;  %v1506_v53 = vadd.f32 %v3119_v48, %v1486_v40 }
 0x14e   :  { %v1395_v56 = vpop.f32.mrf.mxu3  ;;  %v1300_v54 = vpop.f32.mrf.mxu1 }
 0x14f   :  { %v1396_v49 = vadd.f32 %v1395_v56, %v1347_v46  ;;  %v1301_v62 = vadd.f32 %v1300_v54, %v2930_v15  ;;  %v1522_v0 = vmax.f32 %v1506_v53, 0.0 }
 0x150   :  { %v1447_v51 = vpop.f32.mrf.mxu0 }
 0x151   :  { %v1445_v55 = vadd.f32 %v1444_v41, %v1396_v49 }
 0x153   :  { %v1487_v57 = vmul.f32 %v3112_v23, %v1445_v55 }
 0x154   :  { %v1349_v58 = vpop.f32.mrf.mxu2 }
 0x155   :  { %v1507_v59 = vadd.f32 %v3119_v48, %v1487_v57  ;;  %v1350_v60 = vadd.f32 %v1349_v58, %v1301_v62 }
 0x156   :  { %v1398_v61 = vpop.f32.mrf.mxu3  ;;  %v1302_v63 = vpop.f32.mrf.mxu1 }
 0x157   :  { %v1523_v1 = vmax.f32 %v1507_v59, 0.0  ;;  %v1399_v2 = vadd.f32 %v1398_v61, %v1350_v60  ;;  %v1303_v3 = vadd.f32 %v1302_v63, %v2951_v34 }
 0x158   :  { %v1449_v5 = vpop.f32.mrf.mxu0 }
 0x159   :  { %v2297_v7 = vpack.c.bf16 %v1523_v1, %v1522_v0  ;;  %v1448_v14 = vadd.f32 %v1447_v51, %v1399_v2 }
 0x15b   :  { %2298 = vst [vmem:[%s3194_s4] sm:$0xff] %v2297_v7   ;;  %v1488_v6 = vmul.f32 %v3112_v23, %v1448_v14 }
 0x15c   :  { %v1351_v9 = vpop.f32.mrf.mxu2 }
 0x15d   :  { %v1352_v15 = vadd.f32 %v1351_v9, %v1303_v3  ;;  %v1508_v10 = vadd.f32 %v3119_v48, %v1488_v6 }
 0x15e   :  { %v1400_v16 = vpop.f32.mrf.mxu3  ;;  %v1305_v13 = vpop.f32.mrf.mxu1 }
 0x15f   :  { %v1401_v19 = vadd.f32 %v1400_v16, %v1352_v15  ;;  %v1306_v26 = vadd.f32 %v1305_v13, %v2960_v44  ;;  %v1524_v31 = vmax.f32 %v1508_v10, 0.0 }
 0x160   :  { %v1452_v20 = vpop.f32.mrf.mxu0 }
 0x161   :  { %v1450_v12 = vadd.f32 %v1449_v5, %v1401_v19 }
 0x163   :  { %v1489_v24 = vmul.f32 %v3112_v23, %v1450_v12 }
 0x164   :  { %v1354_v27 = vpop.f32.mrf.mxu2 }
 0x165   :  { %v1509_v28 = vadd.f32 %v3119_v48, %v1489_v24  ;;  %v1355_v29 = vadd.f32 %v1354_v27, %v1306_v26 }
 0x166   :  { %v1403_v34 = vpop.f32.mrf.mxu3  ;;  %v1307_v30 = vpop.f32.mrf.mxu1 }
 0x167   :  { %v1525_v32 = vmax.f32 %v1509_v28, 0.0  ;;  %v1404_v11 = vadd.f32 %v1403_v34, %v1355_v29  ;;  %v1308_v22 = vadd.f32 %v1307_v30, %v2981_v4 }
 0x168   :  { %v1454_v35 = vpop.f32.mrf.mxu0 }
 0x169   :  { %v2302_v36 = vpack.c.bf16 %v1525_v32, %v1524_v31  ;;  %v1453_v38 = vadd.f32 %v1452_v20, %v1404_v11 }
 0x16b   :  { %2334 = vst [vmem:[%s3194_s4 + $0x8] sm:$0xff] %v2302_v36   ;;  %v1490_v50 = vmul.f32 %v3112_v23, %v1453_v38 }
 0x16c   :  { %v1356_v39 = vpop.f32.mrf.mxu2 }
 0x16d   :  { %v1357_v44 = vadd.f32 %v1356_v39, %v1308_v22  ;;  %v1510_v54 = vadd.f32 %v3119_v48, %v1490_v50 }
 0x16e   :  { %v1405_v41 = vpop.f32.mrf.mxu3  ;;  %v1310_v43 = vpop.f32.mrf.mxu1 }
 0x16f   :  { %v1406_v45 = vadd.f32 %v1405_v41, %v1357_v44  ;;  %v1311_v49 = vadd.f32 %v1310_v43, %v2990_v18  ;;  %v1526_v62 = vmax.f32 %v1510_v54, 0.0 }
 0x170   :  { %v1457_v46 = vpop.f32.mrf.mxu0 }
 0x171   :  { %v1455_v56 = vadd.f32 %v1454_v35, %v1406_v45 }
 0x173   :  { %v1491_v40 = vmul.f32 %v3112_v23, %v1455_v56 }
 0x174   :  { %v1359_v51 = vpop.f32.mrf.mxu2 }
 0x175   :  { %v1511_v55 = vadd.f32 %v3119_v48, %v1491_v40  ;;  %v1360_v53 = vadd.f32 %v1359_v51, %v1311_v49 }
 0x176   :  { %v1408_v4 = vpop.f32.mrf.mxu3  ;;  %v1312_v57 = vpop.f32.mrf.mxu1 }
 0x177   :  { %v1527_v58 = vmax.f32 %v1511_v55, 0.0  ;;  %v1409_v59 = vadd.f32 %v1408_v4, %v1360_v53  ;;  %v1313_v0 = vadd.f32 %v1312_v57, %v3010_v37 }
 0x178   :  { %v1459_v60 = vpop.f32.mrf.mxu0 }
 0x179   :  { %v2307_v61 = vpack.c.bf16 %v1527_v58, %v1526_v62  ;;  %v1458_v63 = vadd.f32 %v1457_v46, %v1409_v59 }
 0x17b   :  { %2335 = vst [vmem:[%s3194_s4 + $0x10] sm:$0xff] %v2307_v61   ;;  %v1492_v7 = vmul.f32 %v3112_v23, %v1458_v63 }
 0x17c   :  { %v1361_v1 = vpop.f32.mrf.mxu2 }
 0x17d   :  { %v1362_v18 = vadd.f32 %v1361_v1, %v1313_v0  ;;  %v1512_v15 = vadd.f32 %v3119_v48, %v1492_v7 }
 0x17e   :  { %v1410_v2 = vpop.f32.mrf.mxu3  ;;  %v1315_v5 = vpop.f32.mrf.mxu1 }
 0x17f   :  { %v1411_v14 = vadd.f32 %v1410_v2, %v1362_v18  ;;  %v1316_v13 = vadd.f32 %v1315_v5, %v3019_v47  ;;  %v1528_v10 = vmax.f32 %v1512_v15, 0.0 }
 0x180   :  { %v1462_v3 = vpop.f32.mrf.mxu0 }
 0x181   :  { %v1460_v9 = vadd.f32 %v1459_v60, %v1411_v14 }
 0x183   :  { %v1493_v16 = vmul.f32 %v3112_v23, %v1460_v9 }
 0x184   :  { %v1364_v6 = vpop.f32.mrf.mxu2 }
 0x185   :  { %v1513_v19 = vadd.f32 %v3119_v48, %v1493_v16  ;;  %v1365_v20 = vadd.f32 %v1364_v6, %v1316_v13 }
 0x186   :  { %v1413_v37 = vpop.f32.mrf.mxu3  ;;  %v1317_v12 = vpop.f32.mrf.mxu1 }
 0x187   :  { %v1529_v24 = vmax.f32 %v1513_v19, 0.0  ;;  %v1414_v26 = vadd.f32 %v1413_v37, %v1365_v20  ;;  %v1318_v34 = vadd.f32 %v1317_v12, %v3040_v8 }
 0x188   :  { %v1464_v27 = vpop.f32.mrf.mxu0 }
 0x189   :  { %v2312_v28 = vpack.c.bf16 %v1529_v24, %v1528_v10  ;;  %v1463_v29 = vadd.f32 %v1462_v3, %v1414_v26 }
 0x18b   :  { %2336 = vst [vmem:[%s3194_s4 + $0x18] sm:$0xff] %v2312_v28   ;;  %v1494_v11 = vmul.f32 %v3112_v23, %v1463_v29 }
 0x18c   :  { %v1366_v30 = vpop.f32.mrf.mxu2 }
 0x18d   :  { %v1367_v47 = vadd.f32 %v1366_v30, %v1318_v34  ;;  %v1514_v22 = vadd.f32 %v3119_v48, %v1494_v11 }
 0x18e   :  { %v1415_v31 = vpop.f32.mrf.mxu3  ;;  %v1320_v32 = vpop.f32.mrf.mxu1 }
 0x18f   :  { %v1416_v35 = vadd.f32 %v1415_v31, %v1367_v47  ;;  %v1321_v44 = vadd.f32 %v1320_v32, %v3049_v21  ;;  %v1530_v46 = vmax.f32 %v1514_v22, 0.0 }
 0x190   :  { %v1467_v36 = vpop.f32.mrf.mxu0 }
 0x191   :  { %v1465_v38 = vadd.f32 %v1464_v27, %v1416_v35 }
 0x193   :  { %v1495_v39 = vmul.f32 %v3112_v23, %v1465_v38 }
 0x194   :  { %v1369_v41 = vpop.f32.mrf.mxu2 }
 0x195   :  { %v1515_v43 = vadd.f32 %v3119_v48, %v1495_v39  ;;  %v1370_v50 = vadd.f32 %v1369_v41, %v1321_v44 }
 0x196   :  { %v1418_v8 = vpop.f32.mrf.mxu3  ;;  %v1322_v45 = vpop.f32.mrf.mxu1 }
 0x197   :  { %v1531_v56 = vmax.f32 %v1515_v43, 0.0  ;;  %v1419_v54 = vadd.f32 %v1418_v8, %v1370_v50  ;;  %v1323_v55 = vadd.f32 %v1322_v45, %v3070_v42 }
 0x198   :  { %v1469_v40 = vpop.f32.mrf.mxu0 }
 0x199   :  { %v2317_v49 = vpack.c.bf16 %v1531_v56, %v1530_v46  ;;  %v1468_v51 = vadd.f32 %v1467_v36, %v1419_v54 }
 0x19b   :  { %2337 = vst [vmem:[%s3194_s4 + $0x20] sm:$0xff] %v2317_v49   ;;  %v1496_v62 = vmul.f32 %v3112_v23, %v1468_v51 }
 0x19c   :  { %v1371_v53 = vpop.f32.mrf.mxu2 }
 0x19d   :  { %v1372_v21 = vadd.f32 %v1371_v53, %v1323_v55  ;;  %v1516_v61 = vadd.f32 %v3119_v48, %v1496_v62 }
 0x19e   :  { %v1420_v4 = vpop.f32.mrf.mxu3  ;;  %v1325_v57 = vpop.f32.mrf.mxu1 }
 0x19f   :  { %v1421_v58 = vadd.f32 %v1420_v4, %v1372_v21  ;;  %v1326_v0 = vadd.f32 %v1325_v57, %v3079_v52  ;;  %v1532_v7 = vmax.f32 %v1516_v61, 0.0 }
 0x1a0   :  { %v1472_v60 = vpop.f32.mrf.mxu0 }
 0x1a1   :  { %v1470_v59 = vadd.f32 %v1469_v40, %v1421_v58 }
 0x1a3   :  { %v1497_v63 = vmul.f32 %v3112_v23, %v1470_v59 }
 0x1a4   :  { %v1374_v1 = vpop.f32.mrf.mxu2 }
 0x1a5   :  { %v1517_v18 = vadd.f32 %v3119_v48, %v1497_v63  ;;  %v1375_v2 = vadd.f32 %v1374_v1, %v1326_v0 }
 0x1a6   :  { %v1423_v42 = vpop.f32.mrf.mxu3  ;;  %v1327_v5 = vpop.f32.mrf.mxu1 }
 0x1a7   :  { %v1533_v14 = vmax.f32 %v1517_v18, 0.0  ;;  %v1424_v3 = vadd.f32 %v1423_v42, %v1375_v2  ;;  %v1328_v16 = vadd.f32 %v1327_v5, %v3100_v17 }
 0x1a8   :  { %v1474_v13 = vpop.f32.mrf.mxu0 }
 0x1a9   :  { %v2322_v9 = vpack.c.bf16 %v1533_v14, %v1532_v7  ;;  %v1473_v15 = vadd.f32 %v1472_v60, %v1424_v3 }
 0x1ab   :  { %2338 = vst [vmem:[%s3194_s4 + $0x28] sm:$0xff] %v2322_v9   ;;  %v1498_v37 = vmul.f32 %v3112_v23, %v1473_v15 }
 0x1ac   :  { %v1376_v6 = vpop.f32.mrf.mxu2 }
 0x1ad   :  { %v1377_v52 = vadd.f32 %v1376_v6, %v1328_v16  ;;  %v1518_v24 = vadd.f32 %v3119_v48, %v1498_v37 }
 0x1ae   :  { %v1425_v19 = vpop.f32.mrf.mxu3  ;;  %v1330_v20 = vpop.f32.mrf.mxu1 }
 0x1af   :  { %v1426_v12 = vadd.f32 %v1425_v19, %v1377_v52  ;;  %v1331_v27 = vadd.f32 %v1330_v20, %v3103_v25  ;;  %v1534_v47 = vmax.f32 %v1518_v24, 0.0 }
 0x1b0   :  { %v1477_v30 = vpop.f32.mrf.mxu0 }
 0x1b1   :  { %v1475_v10 = vadd.f32 %v1474_v13, %v1426_v12 }
 0x1b3   :  { %v1499_v26 = vmul.f32 %v3112_v23, %v1475_v10 }
 0x1b4   :  { %v1379_v28 = vpop.f32.mrf.mxu2 }
 0x1b5   :  { %v1519_v29 = vadd.f32 %v3119_v48, %v1499_v26  ;;  %v1380_v34 = vadd.f32 %v1379_v28, %v1331_v27 }
 0x1b6   :  { %v1428_v17 = vpop.f32.mrf.mxu3  ;;  %v1332_v11 = vpop.f32.mrf.mxu1 }
 0x1b7   :  { %v1535_v31 = vmax.f32 %v1519_v29, 0.0  ;;  %v1429_v32 = vadd.f32 %v1428_v17, %v1380_v34  ;;  %v1333_v38 = vadd.f32 %v1332_v11, %v3106_v33 }
 0x1b8   :  { %v1479_v43 = vpop.f32.mrf.mxu0 }
 0x1b9   :  { %v2327_v35 = vpack.c.bf16 %v1535_v31, %v1534_v47  ;;  %v1478_v36 = vadd.f32 %v1477_v30, %v1429_v32 }
 0x1bb   :  { %2339 = vst [vmem:[%s3194_s4 + $0x30] sm:$0xff] %v2327_v35   ;;  %v1500_v44 = vmul.f32 %v3112_v23, %v1478_v36 }
 0x1bc   :  { %v1381_v22 = vpop.f32.mrf.mxu2 }
 0x1bd   :  { %v1382_v25 = vadd.f32 %v1381_v22, %v1333_v38  ;;  %v1520_v8 = vadd.f32 %v3119_v48, %v1500_v44 }
 0x1be   :  { %v1430_v39 = vpop.f32.mrf.mxu3 }
 0x1bf   :  { %v1431_v41 = vadd.f32 %v1430_v39, %v1382_v25  ;;  %v1536_v56 = vmax.f32 %v1520_v8, 0.0 }
 0x1c1   :  { %v1480_v50 = vadd.f32 %v1479_v43, %v1431_v41 }
 0x1c3   :  { %v1501_v45 = vmul.f32 %v3112_v23, %v1480_v50 }
 0x1c5   :  { %v1521_v46 = vadd.f32 %v3119_v48, %v1501_v45 }
 0x1c7   :  { %v1537_v54 = vmax.f32 %v1521_v46, 0.0 }
 0x1c9   :  { %v2332_v40 = vpack.c.bf16 %v1537_v54, %v1536_v56 }
 0x1cb   :  { %2340 = vst [vmem:[%s3194_s4 + $0x38] sm:$0xff] %v2332_v40  }

</bundles_post_ra>
